<compile_context>
chip_gen: v5e
topology: v5e:2x2
jax: 0.10.0
libtpu: 0.0.40
codegen_flags: <defaults>
</compile_context>

<pallas_src>
import functools

import jax
import jax.numpy as jnp
from jax import lax
from jax.experimental import pallas as pl
from jax.experimental.pallas import tpu as pltpu

# MXU operand / stored-weight dtype: bf16 (native MXU rate on v5e/v6e/v7x,
# half the operand bandwidth / VMEM).  Accumulation is f32.
MXU_DTYPE = jnp.bfloat16

# Scoped-VMEM budget for the fused WN kernels: above the 16/32 MiB defaults,
# below every generation's physical VMEM (v7x = 64 MiB).
WN_VMEM_LIMIT = 48 * 1024 * 1024

# Pre-net matmuls are memory bound; large row tiles amortize per-step overhead.
ROW_TILE_CAP = 1024


def _mxu_dot(a, b):
    return jnp.dot(a.astype(MXU_DTYPE), b.astype(MXU_DTYPE),
                   preferred_element_type=jnp.float32)


def _pick_row_tile(m, cap=ROW_TILE_CAP):
    """Largest row tile that divides m, is a multiple of 8 and is <= cap."""
    if m <= cap or m % 8 != 0:
        return m
    tm = cap - cap % 8
    while m % tm != 0:
        tm -= 8
    return tm


# ----------------------------------------------------------------------------
# Generic row-tiled linear kernel (used for the strided pre-net convolutions)
# ----------------------------------------------------------------------------
def _linear_kernel(x_ref, w_ref, b_ref, o_ref):
    o_ref[...] = _mxu_dot(x_ref[...], w_ref[...]) + b_ref[...]


def pallas_linear(x, w, b2):
    """x: [M, K] @ w: [K, N] + b2: [1, N] -> [M, N] f32, tiled over rows."""
    M, K = x.shape
    N = w.shape[1]
    tm = _pick_row_tile(M)
    return pl.pallas_call(
        _linear_kernel,
        grid=(M // tm,),
        out_shape=jax.ShapeDtypeStruct((M, N), jnp.float32),
        in_specs=[
            pl.BlockSpec((tm, K), lambda i: (i, 0)),
            pl.BlockSpec((K, N), lambda i: (0, 0)),
            pl.BlockSpec((1, N), lambda i: (0, 0)),
        ],
        out_specs=pl.BlockSpec((tm, N), lambda i: (i, 0)),
        compiler_params=pltpu.CompilerParams(dimension_semantics=("parallel",)),
    )(x, w, b2)


def im2col_1d(x_btc, kernel_size, stride, padding):
    # TODO(synk): fold this strided patch extraction into the WN prologue (or
    # strided pl.ds reads inside the linear kernel) to avoid the HBM round trip.
    B, T, C = x_btc.shape
    xp = jnp.pad(x_btc, ((0, 0), (padding, padding), (0, 0)))
    T_out = (T + 2 * padding - kernel_size) // stride + 1
    cols = [xp[:, k:k + stride * (T_out - 1) + 1:stride, :]
            for k in range(kernel_size)]
    patches = jnp.stack(cols, axis=2)  # [B, T_out, K, C]
    return patches.reshape(B * T_out, kernel_size * C), T_out


def conv1d_pallas(x_btc, w_mat, b2, kernel_size, stride, padding):
    # torch.nn.Conv1d on NCW input; w_mat = weight.permute(2,1,0).reshape(K*Cin, Cout)
    B = x_btc.shape[0]
    patches, T_out = im2col_1d(x_btc, kernel_size, stride, padding)
    y = pallas_linear(patches, w_mat, b2)
    return y.reshape(B, T_out, -1)


def convtranspose1d_pallas(x_btc, w_mat, b2_tiled, stride):
    # ConvTranspose1d with kernel_size == stride (non-overlapping upsample):
    # w_mat = weight.permute(0,2,1).reshape(Cin, K*Cout); b2_tiled = tile(bias, K).
    B, T, C = x_btc.shape
    y = pallas_linear(x_btc.reshape(B * T, C), w_mat, b2_tiled)  # [B*T, K*Cout]
    C_out = y.shape[1] // stride
    return y.reshape(B, T * stride, C_out)


# ----------------------------------------------------------------------------
# Shared WN layer stack (runs on a VMEM-resident [T, H] tile inside a kernel)
# ----------------------------------------------------------------------------
def _wn_layers(x, g, mask, cw_ref, cb_ref, wi_ref, bi_ref, wr_ref, br_ref,
               *, hidden, n_layers):
    """n_layers WaveNet layers (kernel_size=3, dilation=1). Returns skip*mask."""
    H = hidden
    T = x.shape[0]
    zero_row = jnp.zeros((1, H), jnp.float32)

    def layer(i, carry):
        x, skip = carry
        # k=3 "same" conv as ONE [T,3H]@[3H,2H] matmul — no im2col, no halo DMA.
        x_prev = jnp.concatenate([zero_row, x[:T - 1, :]], axis=0)
        x_next = jnp.concatenate([x[1:, :], zero_row], axis=0)
        x3 = jnp.concatenate([x_prev, x, x_next], axis=1)           # [T, 3H]
        x_in = _mxu_dot(x3, wi_ref[i]) + bi_ref[i]                   # [T, 2H]
        # Per-layer cond 1x1 conv (never materialize [T, 2H*n_layers]).
        g_l = _mxu_dot(g, cw_ref[i]) + cb_ref[i]                     # [T, 2H]
        pre = x_in + g_l
        acts = jnp.tanh(pre[:, :H]) * jax.nn.sigmoid(pre[:, H:])
        res_skip = _mxu_dot(acts, wr_ref[i]) + br_ref[i]             # [T, 2H]
        # Last layer's residual half of rs_w / rs_b is zero-padded in init_params,
        # so the residual update is a no-op there (matches the torch WN, which
        # only produces the skip half in the last layer).
        x = (x + res_skip[:, :H]) * mask
        skip = skip + res_skip[:, H:]
        return x, skip

    x, skip = lax.fori_loop(0, n_layers, layer,
                            (x, jnp.zeros((T, H), jnp.float32)))
    return skip * mask


def _prefix_mask(len_ref, T, mask_stride):
    # mask[t] = (t * mask_stride < length) == x_mask[:, ::mask_stride] for a
    # prefix/length mask (rebuilt in-kernel; never streamed from HBM).
    length = len_ref[pl.program_id(0)]
    t_idx = lax.broadcasted_iota(jnp.int32, (T, 1), 0)
    return (t_idx * mask_stride < length).astype(jnp.float32)        # [T, 1]


# ----------------------------------------------------------------------------
# Fused encoder kernel: WN stack + enc_out 1x1 + reparameterize + masked KL
# ----------------------------------------------------------------------------
def _enc_wn_kernel(len_ref, x_ref, g_ref, eps_ref,
                   cw_ref, cb_ref, wi_ref, bi_ref, wr_ref, br_ref,
                   ow_ref, ob_ref,
                   stats_ref, z_ref, kl_ref, ms_ref,
                   *, hidden, n_layers, latent, mask_stride):
    H, L = hidden, latent
    T = x_ref.shape[1]
    mask = _prefix_mask(len_ref, T, mask_stride)

    x = x_ref[0] * mask
    skip = _wn_layers(x, g_ref[0], mask, cw_ref, cb_ref, wi_ref, bi_ref,
                      wr_ref, br_ref, hidden=H, n_layers=n_layers)

    stats = _mxu_dot(skip, ow_ref[...]) + ob_ref[...]                 # [T, 2L]
    stats_ref[0] = stats
    m = stats[:, :L]
    logs = stats[:, L:]
    e = jnp.exp(logs)                                                 # exp once
    z_ref[0] = m + eps_ref[0] * e
    kl = 0.5 * (e * e + m * m) - logs - 0.5                           # KL vs N(0,1)
    kl_ref[0] = jnp.sum(kl * mask, keepdims=True)
    ms_ref[0] = jnp.sum(mask, keepdims=True)


def enc_wn_reparam_pallas(x, g, eps, lengths, wn_p, out_w, out_b,
                          *, hidden, latent, mask_stride):
    B, T, H = x.shape
    Cg = g.shape[-1]
    n_layers = int(wn_p["in_b"].shape[0])
    twoL = out_w.shape[1]

    kernel = functools.partial(_enc_wn_kernel, hidden=H, n_layers=n_layers,
                               latent=latent, mask_stride=mask_stride)

    def full(a):
        return pl.BlockSpec(a.shape, lambda b, lens, _n=a.ndim: (0,) * _n)

    return pl.pallas_call(
        kernel,
        out_shape=(
            jax.ShapeDtypeStruct((B, T, twoL), jnp.float32),
            jax.ShapeDtypeStruct((B, T, latent), jnp.float32),
            jax.ShapeDtypeStruct((B, 1, 1), jnp.float32),
            jax.ShapeDtypeStruct((B, 1, 1), jnp.float32),
        ),
        grid_spec=pltpu.PrefetchScalarGridSpec(
            num_scalar_prefetch=1,
            grid=(B,),
            in_specs=[
                pl.BlockSpec((1, T, H), lambda b, lens: (b, 0, 0)),
                pl.BlockSpec((1, T, Cg), lambda b, lens: (b, 0, 0)),
                pl.BlockSpec((1, T, latent), lambda b, lens: (b, 0, 0)),
                full(wn_p["cond_w"]), full(wn_p["cond_b"]),
                full(wn_p["in_w"]), full(wn_p["in_b"]),
                full(wn_p["rs_w"]), full(wn_p["rs_b"]),
                full(out_w), full(out_b),
            ],
            out_specs=(
                pl.BlockSpec((1, T, twoL), lambda b, lens: (b, 0, 0)),
                pl.BlockSpec((1, T, latent), lambda b, lens: (b, 0, 0)),
                pl.BlockSpec((1, 1, 1), lambda b, lens: (b, 0, 0)),
                pl.BlockSpec((1, 1, 1), lambda b, lens: (b, 0, 0)),
            ),
        ),
        compiler_params=pltpu.CompilerParams(
            dimension_semantics=("parallel",),
            vmem_limit_bytes=WN_VMEM_LIMIT),
    )(lengths, x, g, eps, wn_p["cond_w"], wn_p["cond_b"], wn_p["in_w"],
      wn_p["in_b"], wn_p["rs_w"], wn_p["rs_b"], out_w, out_b)


# ----------------------------------------------------------------------------
# Fused decoder kernel: WN stack + out_proj 1x1
# ----------------------------------------------------------------------------
def _dec_wn_kernel(len_ref, x_ref, g_ref,
                   cw_ref, cb_ref, wi_ref, bi_ref, wr_ref, br_ref,
                   ow_ref, ob_ref, y_ref,
                   *, hidden, n_layers, mask_stride):
    H = hidden
    T = x_ref.shape[1]
    mask = _prefix_mask(len_ref, T, mask_stride)
    x = x_ref[0] * mask
    skip = _wn_layers(x, g_ref[0], mask, cw_ref, cb_ref, wi_ref, bi_ref,
                      wr_ref, br_ref, hidden=H, n_layers=n_layers)
    y_ref[0] = _mxu_dot(skip, ow_ref[...]) + ob_ref[...]


def dec_wn_pallas(x, g, lengths, wn_p, out_w, out_b, *, hidden, mask_stride):
    B, T, H = x.shape
    Cg = g.shape[-1]
    n_layers = int(wn_p["in_b"].shape[0])
    Cout = out_w.shape[1]

    kernel = functools.partial(_dec_wn_kernel, hidden=H, n_layers=n_layers,
                               mask_stride=mask_stride)

    def full(a):
        return pl.BlockSpec(a.shape, lambda b, lens, _n=a.ndim: (0,) * _n)

    return pl.pallas_call(
        kernel,
        out_shape=jax.ShapeDtypeStruct((B, T, Cout), jnp.float32),
        grid_spec=pltpu.PrefetchScalarGridSpec(
            num_scalar_prefetch=1,
            grid=(B,),
            in_specs=[
                pl.BlockSpec((1, T, H), lambda b, lens: (b, 0, 0)),
                pl.BlockSpec((1, T, Cg), lambda b, lens: (b, 0, 0)),
                full(wn_p["cond_w"]), full(wn_p["cond_b"]),
                full(wn_p["in_w"]), full(wn_p["in_b"]),
                full(wn_p["rs_w"]), full(wn_p["rs_b"]),
                full(out_w), full(out_b),
            ],
            out_specs=pl.BlockSpec((1, T, Cout), lambda b, lens: (b, 0, 0)),
        ),
        compiler_params=pltpu.CompilerParams(
            dimension_semantics=("parallel",),
            vmem_limit_bytes=WN_VMEM_LIMIT),
    )(lengths, x, g, wn_p["cond_w"], wn_p["cond_b"], wn_p["in_w"],
      wn_p["in_b"], wn_p["rs_w"], wn_p["rs_b"], out_w, out_b)


# ----------------------------------------------------------------------------
# FVAE forward (training path, infer=False)
# ----------------------------------------------------------------------------
def fvae_forward(params, x_btc, x_mask_bt, g_btc, eps_key, cfg):
    """x_btc: [B,T,Cio], x_mask_bt: [B,T] prefix mask, g_btc: [B,T,Cg].

    Returns (x_recon [B,T,Cio], loss_kl, z_q [B,Ts,L], m_q, logs_q) — already in
    the layout of the PyTorch .transpose(1, 2) outputs.
    """
    B, T, _ = x_btc.shape
    s, H, L = cfg["stride"], cfg["hidden"], cfg["latent"]
    assert cfg["kernel"] == 3, "fused WN kernel implements kernel_size=3"

    # Prefix mask -> lengths; masks are rebuilt in-kernel from these.
    # (Assumes x_mask is a standard prefix/length mask.)
    lengths = jnp.sum(x_mask_bt, axis=1).astype(jnp.int32)            # [B]

    # g_pre_net : Conv1d(Cg, Cg, k=2s, stride=s, pad=s//2)
    g_sqz = conv1d_pallas(g_btc, params["g_pre_w"], params["g_pre_b"],
                          2 * s, s, s // 2)                           # [B, Ts, Cg]

    # ----- encoder: strided pre_net conv -> fused (WN stack + out_proj + reparam + KL)
    h = conv1d_pallas(x_btc, params["enc_pre_w"], params["enc_pre_b"],
                      2 * s, s, s // 2)                               # [B, Ts, H]
    Ts = h.shape[1]
    eps = jax.random.normal(eps_key, (B, Ts, L), dtype=jnp.float32)   # tiny; streamed in

    stats, z_q, kl_sums, mask_sums = enc_wn_reparam_pallas(
        h, g_sqz, eps, lengths, params["enc_wn"],
        params["enc_out_w"], params["enc_out_b"],
        hidden=H, latent=L, mask_stride=s)
    m_q = stats[..., :L]
    logs_q = stats[..., L:]
    # (kl * mask).sum() / mask.sum() / latent_size
    loss_kl = jnp.sum(kl_sums) / jnp.sum(mask_sums) / L

    # ----- decoder: ConvTranspose pre_net -> fused (WN stack + out_proj)
    d = convtranspose1d_pallas(z_q, params["dec_pre_w"], params["dec_pre_b"], s)
    x_recon = dec_wn_pallas(d, g_btc, lengths, params["dec_wn"],
                            params["dec_out_w"], params["dec_out_b"],
                            hidden=H, mask_stride=1)                  # [B, T, Cio]

    return x_recon, loss_kl, z_q, m_q, logs_q


# ----------------------------------------------------------------------------
# Deterministic parameter init (matmul-layout equivalents of the torch convs)
# ----------------------------------------------------------------------------
class ParamGen:
    def __init__(self, key, scale=0.1):
        self.key, self.scale, self.i = key, scale, 0

    def __call__(self, shape):
        self.i += 1
        k = jax.random.fold_in(self.key, self.i)
        return self.scale * jax.random.normal(k, shape, dtype=jnp.float32)


def init_params(key, cfg):
    gen = ParamGen(key)
    Cio, H, L, Cg = cfg["in_out"], cfg["hidden"], cfg["latent"], cfg["gin"]
    s = cfg["stride"]
    Ke = 2 * s
    wdt = MXU_DTYPE   # weights stored bf16; biases stay f32

    def wn_params(n_layers):
        # Last layer's res/skip 1x1 only produces the skip half in the torch WN;
        # store it zero-padded on the residual half so the layer stack is uniform.
        rs_w, rs_b = [], []
        for i in range(n_layers):
            if i < n_layers - 1:
                rs_w.append(gen((H, 2 * H)))
                rs_b.append(gen((1, 2 * H)))
            else:
                rs_w.append(jnp.concatenate(
                    [jnp.zeros((H, H), jnp.float32), gen((H, H))], axis=1))
                rs_b.append(jnp.concatenate(
                    [jnp.zeros((1, H), jnp.float32), gen((1, H))], axis=1))
        return dict(
            # cond_w[l]: [Cg, 2H] slice of Conv1d(Cg, 2H*n_layers, 1)
            cond_w=jnp.stack([gen((Cg, 2 * H)) for _ in range(n_layers)]).astype(wdt),
            cond_b=jnp.stack([gen((1, 2 * H)) for _ in range(n_layers)]),
            # in_w[l]: [3H, 2H] with rows [0:H]=k-1 tap, [H:2H]=k tap, [2H:3H]=k+1 tap
            in_w=jnp.stack([gen((3 * H, 2 * H)) for _ in range(n_layers)]).astype(wdt),
            in_b=jnp.stack([gen((1, 2 * H)) for _ in range(n_layers)]),
            rs_w=jnp.stack(rs_w).astype(wdt),
            rs_b=jnp.stack(rs_b),
        )

    return dict(
        g_pre_w=gen((Ke * Cg, Cg)).astype(wdt), g_pre_b=gen((1, Cg)),   # Conv1d(Cg, Cg, 2s, s, s//2)
        enc_pre_w=gen((Ke * Cio, H)).astype(wdt), enc_pre_b=gen((1, H)),  # Conv1d(Cio, H, 2s, s, s//2)
        enc_wn=wn_params(cfg["enc_layers"]),
        enc_out_w=gen((H, 2 * L)).astype(wdt), enc_out_b=gen((1, 2 * L)),  # Conv1d(H, 2L, 1)
        dec_pre_w=gen((L, s * H)).astype(wdt),                         # ConvTranspose1d(L, H, s, s)
        dec_pre_b=jnp.tile(gen((1, H)), (1, s)),                       # bias pre-tiled (k-major)
        dec_wn=wn_params(cfg["dec_layers"]),
        dec_out_w=gen((H, Cio)).astype(wdt), dec_out_b=gen((1, Cio)),  # Conv1d(H, Cio, 1)
    )


# ----------------------------------------------------------------------------
if __name__ == "__main__":
    cfg = dict(in_out=64, hidden=32, latent=16, gin=16,
               enc_layers=2, dec_layers=2, stride=4, kernel=3)
    B, T = 2, 32

    key = jax.random.PRNGKey(0)
    kx, kg, kp, keps = jax.random.split(key, 4)
    x = jax.random.normal(kx, (B, T, cfg["in_out"]), dtype=jnp.float32)  # [B, T, C_in_out]
    g = jax.random.normal(kg, (B, T, cfg["gin"]), dtype=jnp.float32)     # [B, T, C_g]
    lengths = jnp.array([T, 24])
    x_mask = (jnp.arange(T)[None, :] < lengths[:, None]).astype(jnp.float32)  # [B, T]

    params = init_params(kp, cfg)

    fwd = jax.jit(functools.partial(fvae_forward, cfg=cfg))
    out = fwd(params, x, x_mask, g, keps)
    jax.block_until_ready(out)

    x_recon, loss_kl, z_q, m_q, logs_q = out
    Ts = T // cfg["stride"]
    assert x_recon.shape == (B, T, cfg["in_out"])
    assert z_q.shape == (B, Ts, cfg["latent"])
    assert m_q.shape == logs_q.shape == z_q.shape
    assert loss_kl.shape == ()
    assert bool(jnp.isfinite(loss_kl))
    assert bool(jnp.all(jnp.isfinite(x_recon)))
    print("KERNEL_OK")
</pallas_src>

<mosaic_0001>
module attributes {stable_mosaic.version = 11 : i64} {
  func.func @_linear_kernel(%arg0: i32, %arg1: memref<16x128xf32, #tpu.memory_space<vmem>>, %arg2: memref<128x16xbf16, #tpu.memory_space<vmem>>, %arg3: memref<1x16xf32, #tpu.memory_space<vmem>>, %arg4: memref<16x16xf32, #tpu.memory_space<vmem>>) attributes {dimension_semantics = [#tpu.dimension_semantics<parallel>], iteration_bounds = array<i64: 1>, scalar_prefetch = 0 : i64, scratch_operands = 0 : i64, tpu.core_type = #tpu.core_type<tc>, window_params = [{transform_indices = @transform_0, window_bounds = array<i64: 16, 128>}, {pipeline_mode = #tpu.pipeline_mode<synchronous>, transform_indices = @transform_1, window_bounds = array<i64: 128, 16>}, {pipeline_mode = #tpu.pipeline_mode<synchronous>, transform_indices = @transform_2, window_bounds = array<i64: 1, 16>}, {transform_indices = @transform_3, window_bounds = array<i64: 16, 16>}]} {
    %c0 = arith.constant 0 : index
    %c0_0 = arith.constant 0 : index
    %0 = vector.load %arg1[%c0, %c0_0] : memref<16x128xf32, #tpu.memory_space<vmem>>, vector<16x128xf32>
    %c0_1 = arith.constant 0 : index
    %c0_2 = arith.constant 0 : index
    %1 = vector.load %arg2[%c0_1, %c0_2] : memref<128x16xbf16, #tpu.memory_space<vmem>>, vector<128x16xbf16>
    %2 = arith.truncf %0 : vector<16x128xf32> to vector<16x128xbf16>
    %cst = arith.constant dense<0.000000e+00> : vector<16x16xf32>
    %3 = tpu.matmul %2, %1, %cst {dimension_numbers = #tpu.dot_dimension_numbers<[1], [0], [0], [1], [0, 0, 1, 1], [], []>} : vector<16x128xbf16>, vector<128x16xbf16>, vector<16x16xf32> -> vector<16x16xf32>
    %c0_3 = arith.constant 0 : index
    %c0_4 = arith.constant 0 : index
    %4 = vector.load %arg3[%c0_3, %c0_4] : memref<1x16xf32, #tpu.memory_space<vmem>>, vector<1x16xf32>
    %5 = vector.broadcast %4 : vector<1x16xf32> to vector<16x16xf32>
    %6 = arith.addf %3, %5 : vector<16x16xf32>
    %c0_5 = arith.constant 0 : index
    %c0_6 = arith.constant 0 : index
    %7 = vector.load %arg4[%c0_5, %c0_6] : memref<16x16xf32, #tpu.memory_space<vmem>>, vector<16x16xf32>
    tpu.vector_store %arg4[%c0_5, %c0_6], %6 {strides = array<i32>} : memref<16x16xf32, #tpu.memory_space<vmem>>, vector<16x16xf32>,
    return
  }
  func.func @transform_0(%arg0: i32) -> (i32, i32) {
    %c0_i32 = arith.constant 0 : i32
    %c0_i32_0 = arith.constant 0 : i32
    return %arg0, %c0_i32 : i32, i32
  }
  func.func @transform_1(%arg0: i32) -> (i32, i32) {
    %c0_i32 = arith.constant 0 : i32
    %c0_i32_0 = arith.constant 0 : i32
    %c0_i32_1 = arith.constant 0 : i32
    return %c0_i32, %c0_i32_0 : i32, i32
  }
  func.func @transform_2(%arg0: i32) -> (i32, i32) {
    %c0_i32 = arith.constant 0 : i32
    %c0_i32_0 = arith.constant 0 : i32
    %c0_i32_1 = arith.constant 0 : i32
    return %c0_i32, %c0_i32_0 : i32, i32
  }
  func.func @transform_3(%arg0: i32) -> (i32, i32) {
    %c0_i32 = arith.constant 0 : i32
    %c0_i32_0 = arith.constant 0 : i32
    return %arg0, %c0_i32 : i32, i32
  }
}

module attributes {stable_mosaic.version = 11 : i64} {
  func.func @_linear_kernel(%arg0: i32, %arg1: memref<16x512xf32, #tpu.memory_space<vmem>>, %arg2: memref<512x32xbf16, #tpu.memory_space<vmem>>, %arg3: memref<1x32xf32, #tpu.memory_space<vmem>>, %arg4: memref<16x32xf32, #tpu.memory_space<vmem>>) attributes {dimension_semantics = [#tpu.dimension_semantics<parallel>], iteration_bounds = array<i64: 1>, scalar_prefetch = 0 : i64, scratch_operands = 0 : i64, tpu.core_type = #tpu.core_type<tc>, window_params = [{transform_indices = @transform_0, window_bounds = array<i64: 16, 512>}, {pipeline_mode = #tpu.pipeline_mode<synchronous>, transform_indices = @transform_1, window_bounds = array<i64: 512, 32>}, {pipeline_mode = #tpu.pipeline_mode<synchronous>, transform_indices = @transform_2, window_bounds = array<i64: 1, 32>}, {transform_indices = @transform_3, window_bounds = array<i64: 16, 32>}]} {
    %c0 = arith.constant 0 : index
    %c0_0 = arith.constant 0 : index
    %0 = vector.load %arg1[%c0, %c0_0] : memref<16x512xf32, #tpu.memory_space<vmem>>, vector<16x512xf32>
    %c0_1 = arith.constant 0 : index
    %c0_2 = arith.constant 0 : index
    %1 = vector.load %arg2[%c0_1, %c0_2] : memref<512x32xbf16, #tpu.memory_space<vmem>>, vector<512x32xbf16>
    %2 = arith.truncf %0 : vector<16x512xf32> to vector<16x512xbf16>
    %cst = arith.constant dense<0.000000e+00> : vector<16x32xf32>
    %3 = tpu.matmul %2, %1, %cst {dimension_numbers = #tpu.dot_dimension_numbers<[1], [0], [0], [1], [0, 0, 1, 1], [], []>} : vector<16x512xbf16>, vector<512x32xbf16>, vector<16x32xf32> -> vector<16x32xf32>
    %c0_3 = arith.constant 0 : index
    %c0_4 = arith.constant 0 : index
    %4 = vector.load %arg3[%c0_3, %c0_4] : memref<1x32xf32, #tpu.memory_space<vmem>>, vector<1x32xf32>
    %5 = vector.broadcast %4 : vector<1x32xf32> to vector<16x32xf32>
    %6 = arith.addf %3, %5 : vector<16x32xf32>
    %c0_5 = arith.constant 0 : index
    %c0_6 = arith.constant 0 : index
    %7 = vector.load %arg4[%c0_5, %c0_6] : memref<16x32xf32, #tpu.memory_space<vmem>>, vector<16x32xf32>
    tpu.vector_store %arg4[%c0_5, %c0_6], %6 {strides = array<i32>} : memref<16x32xf32, #tpu.memory_space<vmem>>, vector<16x32xf32>,
    return
  }
  func.func @transform_0(%arg0: i32) -> (i32, i32) {
    %c0_i32 = arith.constant 0 : i32
    %c0_i32_0 = arith.constant 0 : i32
    return %arg0, %c0_i32 : i32, i32
  }
  func.func @transform_1(%arg0: i32) -> (i32, i32) {
    %c0_i32 = arith.constant 0 : i32
    %c0_i32_0 = arith.constant 0 : i32
    %c0_i32_1 = arith.constant 0 : i32
    return %c0_i32, %c0_i32_0 : i32, i32
  }
  func.func @transform_2(%arg0: i32) -> (i32, i32) {
    %c0_i32 = arith.constant 0 : i32
    %c0_i32_0 = arith.constant 0 : i32
    %c0_i32_1 = arith.constant 0 : i32
    return %c0_i32, %c0_i32_0 : i32, i32
  }
  func.func @transform_3(%arg0: i32) -> (i32, i32) {
    %c0_i32 = arith.constant 0 : i32
    %c0_i32_0 = arith.constant 0 : i32
    return %arg0, %c0_i32 : i32, i32
  }
}

module attributes {stable_mosaic.version = 11 : i64} {
  func.func @_enc_wn_kernel(%arg0: i32, %arg1: memref<2xi32, #tpu.memory_space<smem>>, %arg2: memref<1x8x32xf32, #tpu.memory_space<vmem>>, %arg3: memref<1x8x16xf32, #tpu.memory_space<vmem>>, %arg4: memref<1x8x16xf32, #tpu.memory_space<vmem>>, %arg5: memref<2x16x64xbf16, #tpu.memory_space<vmem>>, %arg6: memref<2x1x64xf32, #tpu.memory_space<vmem>>, %arg7: memref<2x96x64xbf16, #tpu.memory_space<vmem>>, %arg8: memref<2x1x64xf32, #tpu.memory_space<vmem>>, %arg9: memref<2x32x64xbf16, #tpu.memory_space<vmem>>, %arg10: memref<2x1x64xf32, #tpu.memory_space<vmem>>, %arg11: memref<32x32xbf16, #tpu.memory_space<vmem>>, %arg12: memref<1x32xf32, #tpu.memory_space<vmem>>, %arg13: memref<1x8x32xf32, #tpu.memory_space<vmem>>, %arg14: memref<1x8x16xf32, #tpu.memory_space<vmem>>, %arg15: memref<1x1x1xf32, #tpu.memory_space<vmem>>, %arg16: memref<1x1x1xf32, #tpu.memory_space<vmem>>) attributes {dimension_semantics = [#tpu.dimension_semantics<parallel>], iteration_bounds = array<i64: 2>, scalar_prefetch = 1 : i64, scratch_operands = 0 : i64, tpu.core_type = #tpu.core_type<tc>, window_params = [{transform_indices = @transform_0, window_bounds = array<i64: 1, 8, 32>}, {transform_indices = @transform_1, window_bounds = array<i64: 1, 8, 16>}, {transform_indices = @transform_2, window_bounds = array<i64: 1, 8, 16>}, {pipeline_mode = #tpu.pipeline_mode<synchronous>, transform_indices = @transform_3, window_bounds = array<i64: 2, 16, 64>}, {pipeline_mode = #tpu.pipeline_mode<synchronous>, transform_indices = @transform_4, window_bounds = array<i64: 2, 1, 64>}, {pipeline_mode = #tpu.pipeline_mode<synchronous>, transform_indices = @transform_5, window_bounds = array<i64: 2, 96, 64>}, {pipeline_mode = #tpu.pipeline_mode<synchronous>, transform_indices = @transform_6, window_bounds = array<i64: 2, 1, 64>}, {pipeline_mode = #tpu.pipeline_mode<synchronous>, transform_indices = @transform_7, window_bounds = array<i64: 2, 32, 64>}, {pipeline_mode = #tpu.pipeline_mode<synchronous>, transform_indices = @transform_8, window_bounds = array<i64: 2, 1, 64>}, {pipeline_mode = #tpu.pipeline_mode<synchronous>, transform_indices = @transform_9, window_bounds = array<i64: 32, 32>}, {pipeline_mode = #tpu.pipeline_mode<synchronous>, transform_indices = @transform_10, window_bounds = array<i64: 1, 32>}, {transform_indices = @transform_11, window_bounds = array<i64: 1, 8, 32>}, {transform_indices = @transform_12, window_bounds = array<i64: 1, 8, 16>}, {transform_indices = @transform_13, window_bounds = array<i64: 1, 1, 1>}, {transform_indices = @transform_14, window_bounds = array<i64: 1, 1, 1>}]} {
    %0 = arith.index_cast %arg0 : i32 to index
    %1 = memref.load %arg1[%0] : memref<2xi32, #tpu.memory_space<smem>>
    %2 = tpu.iota {dimensions = array<i32: 0>} : vector<8x1xi32>
    %c4_i32 = arith.constant 4 : i32
    %3 = vector.broadcast %c4_i32 : i32 to vector<8x1xi32>
    %4 = arith.muli %2, %3 : vector<8x1xi32>
    %5 = vector.broadcast %1 : i32 to vector<8x1xi32>
    %6 = arith.cmpi slt, %4, %5 : vector<8x1xi32>
    %7 = arith.extui %6 : vector<8x1xi1> to vector<8x1xi32>
    %8 = arith.sitofp %7 : vector<8x1xi32> to vector<8x1xf32>
    %c0 = arith.constant 0 : index
    %c0_0 = arith.constant 0 : index
    %c0_1 = arith.constant 0 : index
    %9 = vector.load %arg2[%c0, %c0_0, %c0_1] : memref<1x8x32xf32, #tpu.memory_space<vmem>>, vector<1x8x32xf32>
    %10 = vector.shape_cast %9 : vector<1x8x32xf32> to vector<8x32xf32>
    %11 = vector.broadcast %8 : vector<8x1xf32> to vector<8x32xf32>
    %12 = arith.mulf %10, %11 : vector<8x32xf32>
    %c0_2 = arith.constant 0 : index
    %c0_3 = arith.constant 0 : index
    %c0_4 = arith.constant 0 : index
    %13 = vector.load %arg3[%c0_2, %c0_3, %c0_4] : memref<1x8x16xf32, #tpu.memory_space<vmem>>, vector<1x8x16xf32>
    %14 = vector.shape_cast %13 : vector<1x8x16xf32> to vector<8x16xf32>
    %cst = arith.constant 0.000000e+00 : f32
    %15 = vector.broadcast %cst : f32 to vector<1x32xf32>
    %cst_5 = arith.constant 0.000000e+00 : f32
    %16 = vector.broadcast %cst_5 : f32 to vector<8x32xf32>
    %c0_i32 = arith.constant 0 : i32
    %c2_i32 = arith.constant 2 : i32
    %17 = arith.addi %c0_i32, %c2_i32 : i32
    %c1_i32 = arith.constant 1 : i32
    %18:2 = scf.for %arg17 = %c0_i32 to %17 step %c1_i32 iter_args(%arg18 = %12, %arg19 = %16) -> (vector<8x32xf32>, vector<8x32xf32>)  : i32 {
      %66 = vector.extract_strided_slice %arg18 {offsets = [0, 0], sizes = [7, 32], strides = [1, 1]} : vector<8x32xf32> to vector<7x32xf32>
      %67 = tpu.concatenate %15, %66 in 0 : vector<1x32xf32>, vector<7x32xf32> -> vector<8x32xf32>
      %68 = vector.extract_strided_slice %arg18 {offsets = [1, 0], sizes = [7, 32], strides = [1, 1]} : vector<8x32xf32> to vector<7x32xf32>
      %69 = tpu.concatenate %68, %15 in 0 : vector<7x32xf32>, vector<1x32xf32> -> vector<8x32xf32>
      %70 = tpu.concatenate %67, %arg18, %69 in 1 : vector<8x32xf32>, vector<8x32xf32>, vector<8x32xf32> -> vector<8x96xf32>
      %71 = arith.index_cast %arg17 : i32 to index
      %c0_31 = arith.constant 0 : index
      %c0_32 = arith.constant 0 : index
      %72 = vector.load %arg7[%71, %c0_31, %c0_32] : memref<2x96x64xbf16, #tpu.memory_space<vmem>>, vector<1x96x64xbf16>
      %73 = vector.shape_cast %72 : vector<1x96x64xbf16> to vector<96x64xbf16>
      %74 = arith.truncf %70 : vector<8x96xf32> to vector<8x96xbf16>
      %cst_33 = arith.constant dense<0.000000e+00> : vector<8x64xf32>
      %75 = tpu.matmul %74, %73, %cst_33 {dimension_numbers = #tpu.dot_dimension_numbers<[1], [0], [0], [1], [0, 0, 1, 1], [], []>} : vector<8x96xbf16>, vector<96x64xbf16>, vector<8x64xf32> -> vector<8x64xf32>
      %76 = arith.index_cast %arg17 : i32 to index
      %c0_34 = arith.constant 0 : index
      %c0_35 = arith.constant 0 : index
      %77 = vector.load %arg8[%76, %c0_34, %c0_35] : memref<2x1x64xf32, #tpu.memory_space<vmem>>, vector<1x1x64xf32>
      %78 = vector.shape_cast %77 : vector<1x1x64xf32> to vector<1x64xf32>
      %79 = vector.broadcast %78 : vector<1x64xf32> to vector<8x64xf32>
      %80 = arith.addf %75, %79 : vector<8x64xf32>
      %81 = arith.index_cast %arg17 : i32 to index
      %c0_36 = arith.constant 0 : index
      %c0_37 = arith.constant 0 : index
      %82 = vector.load %arg5[%81, %c0_36, %c0_37] : memref<2x16x64xbf16, #tpu.memory_space<vmem>>, vector<1x16x64xbf16>
      %83 = vector.shape_cast %82 : vector<1x16x64xbf16> to vector<16x64xbf16>
      %84 = arith.truncf %14 : vector<8x16xf32> to vector<8x16xbf16>
      %cst_38 = arith.constant dense<0.000000e+00> : vector<8x64xf32>
      %85 = tpu.matmul %84, %83, %cst_38 {dimension_numbers = #tpu.dot_dimension_numbers<[1], [0], [0], [1], [0, 0, 1, 1], [], []>} : vector<8x16xbf16>, vector<16x64xbf16>, vector<8x64xf32> -> vector<8x64xf32>
      %86 = arith.index_cast %arg17 : i32 to index
      %c0_39 = arith.constant 0 : index
      %c0_40 = arith.constant 0 : index
      %87 = vector.load %arg6[%86, %c0_39, %c0_40] : memref<2x1x64xf32, #tpu.memory_space<vmem>>, vector<1x1x64xf32>
      %88 = vector.shape_cast %87 : vector<1x1x64xf32> to vector<1x64xf32>
      %89 = vector.broadcast %88 : vector<1x64xf32> to vector<8x64xf32>
      %90 = arith.addf %85, %89 : vector<8x64xf32>
      %91 = arith.addf %80, %90 : vector<8x64xf32>
      %92 = vector.extract_strided_slice %91 {offsets = [0, 0], sizes = [8, 32], strides = [1, 1]} : vector<8x64xf32> to vector<8x32xf32>
      %93 = math.tanh %92 : vector<8x32xf32>
      %94 = vector.extract_strided_slice %91 {offsets = [0, 32], sizes = [8, 32], strides = [1, 1]} : vector<8x64xf32> to vector<8x32xf32>
      %95 = arith.negf %94 : vector<8x32xf32>
      %96 = math.exp %95 : vector<8x32xf32>
      %cst_41 = arith.constant 1.000000e+00 : f32
      %97 = vector.broadcast %cst_41 : f32 to vector<8x32xf32>
      %98 = arith.addf %97, %96 : vector<8x32xf32>
      %99 = arith.divf %97, %98 : vector<8x32xf32>
      %100 = arith.mulf %93, %99 : vector<8x32xf32>
      %101 = arith.index_cast %arg17 : i32 to index
      %c0_42 = arith.constant 0 : index
      %c0_43 = arith.constant 0 : index
      %102 = vector.load %arg9[%101, %c0_42, %c0_43] : memref<2x32x64xbf16, #tpu.memory_space<vmem>>, vector<1x32x64xbf16>
      %103 = vector.shape_cast %102 : vector<1x32x64xbf16> to vector<32x64xbf16>
      %104 = arith.truncf %100 : vector<8x32xf32> to vector<8x32xbf16>
      %cst_44 = arith.constant dense<0.000000e+00> : vector<8x64xf32>
      %105 = tpu.matmul %104, %103, %cst_44 {dimension_numbers = #tpu.dot_dimension_numbers<[1], [0], [0], [1], [0, 0, 1, 1], [], []>} : vector<8x32xbf16>, vector<32x64xbf16>, vector<8x64xf32> -> vector<8x64xf32>
      %106 = arith.index_cast %arg17 : i32 to index
      %c0_45 = arith.constant 0 : index
      %c0_46 = arith.constant 0 : index
      %107 = vector.load %arg10[%106, %c0_45, %c0_46] : memref<2x1x64xf32, #tpu.memory_space<vmem>>, vector<1x1x64xf32>
      %108 = vector.shape_cast %107 : vector<1x1x64xf32> to vector<1x64xf32>
      %109 = vector.broadcast %108 : vector<1x64xf32> to vector<8x64xf32>
      %110 = arith.addf %105, %109 : vector<8x64xf32>
      %111 = vector.extract_strided_slice %110 {offsets = [0, 0], sizes = [8, 32], strides = [1, 1]} : vector<8x64xf32> to vector<8x32xf32>
      %112 = arith.addf %arg18, %111 : vector<8x32xf32>
      %113 = vector.broadcast %8 : vector<8x1xf32> to vector<8x32xf32>
      %114 = arith.mulf %112, %113 : vector<8x32xf32>
      %115 = vector.extract_strided_slice %110 {offsets = [0, 32], sizes = [8, 32], strides = [1, 1]} : vector<8x64xf32> to vector<8x32xf32>
      %116 = arith.addf %arg19, %115 : vector<8x32xf32>
      scf.yield %114, %116 : vector<8x32xf32>, vector<8x32xf32>
    }
    %c2_i32_6 = arith.constant 2 : i32
    %19 = vector.broadcast %8 : vector<8x1xf32> to vector<8x32xf32>
    %20 = arith.mulf %18#1, %19 : vector<8x32xf32>
    %c0_7 = arith.constant 0 : index
    %c0_8 = arith.constant 0 : index
    %21 = vector.load %arg11[%c0_7, %c0_8] : memref<32x32xbf16, #tpu.memory_space<vmem>>, vector<32x32xbf16>
    %22 = arith.truncf %20 : vector<8x32xf32> to vector<8x32xbf16>
    %cst_9 = arith.constant dense<0.000000e+00> : vector<8x32xf32>
    %23 = tpu.matmul %22, %21, %cst_9 {dimension_numbers = #tpu.dot_dimension_numbers<[1], [0], [0], [1], [0, 0, 1, 1], [], []>} : vector<8x32xbf16>, vector<32x32xbf16>, vector<8x32xf32> -> vector<8x32xf32>
    %c0_10 = arith.constant 0 : index
    %c0_11 = arith.constant 0 : index
    %24 = vector.load %arg12[%c0_10, %c0_11] : memref<1x32xf32, #tpu.memory_space<vmem>>, vector<1x32xf32>
    %25 = vector.broadcast %24 : vector<1x32xf32> to vector<8x32xf32>
    %26 = arith.addf %23, %25 : vector<8x32xf32>
    %c0_12 = arith.constant 0 : index
    %c0_13 = arith.constant 0 : index
    %c0_14 = arith.constant 0 : index
    %27 = vector.load %arg13[%c0_12, %c0_13, %c0_14] : memref<1x8x32xf32, #tpu.memory_space<vmem>>, vector<1x8x32xf32>
    %28 = vector.shape_cast %27 : vector<1x8x32xf32> to vector<8x32xf32>
    %29 = vector.shape_cast %26 : vector<8x32xf32> to vector<1x8x32xf32>
    tpu.vector_store %arg13[%c0_12, %c0_13, %c0_14], %29 {strides = array<i32>} : memref<1x8x32xf32, #tpu.memory_space<vmem>>, vector<1x8x32xf32>,
    %30 = vector.extract_strided_slice %26 {offsets = [0, 0], sizes = [8, 16], strides = [1, 1]} : vector<8x32xf32> to vector<8x16xf32>
    %31 = vector.extract_strided_slice %26 {offsets = [0, 16], sizes = [8, 16], strides = [1, 1]} : vector<8x32xf32> to vector<8x16xf32>
    %32 = math.exp %31 : vector<8x16xf32>
    %c0_15 = arith.constant 0 : index
    %c0_16 = arith.constant 0 : index
    %c0_17 = arith.constant 0 : index
    %33 = vector.load %arg4[%c0_15, %c0_16, %c0_17] : memref<1x8x16xf32, #tpu.memory_space<vmem>>, vector<1x8x16xf32>
    %34 = vector.shape_cast %33 : vector<1x8x16xf32> to vector<8x16xf32>
    %35 = arith.mulf %34, %32 : vector<8x16xf32>
    %36 = arith.addf %30, %35 : vector<8x16xf32>
    %c0_18 = arith.constant 0 : index
    %c0_19 = arith.constant 0 : index
    %c0_20 = arith.constant 0 : index
    %37 = vector.load %arg14[%c0_18, %c0_19, %c0_20] : memref<1x8x16xf32, #tpu.memory_space<vmem>>, vector<1x8x16xf32>
    %38 = vector.shape_cast %37 : vector<1x8x16xf32> to vector<8x16xf32>
    %39 = vector.shape_cast %36 : vector<8x16xf32> to vector<1x8x16xf32>
    tpu.vector_store %arg14[%c0_18, %c0_19, %c0_20], %39 {strides = array<i32>} : memref<1x8x16xf32, #tpu.memory_space<vmem>>, vector<1x8x16xf32>,
    %40 = arith.mulf %32, %32 : vector<8x16xf32>
    %41 = arith.mulf %30, %30 : vector<8x16xf32>
    %42 = arith.addf %40, %41 : vector<8x16xf32>
    %cst_21 = arith.constant 5.000000e-01 : f32
    %43 = vector.broadcast %cst_21 : f32 to vector<8x16xf32>
    %44 = arith.mulf %43, %42 : vector<8x16xf32>
    %45 = arith.subf %44, %31 : vector<8x16xf32>
    %cst_22 = arith.constant 5.000000e-01 : f32
    %46 = vector.broadcast %cst_22 : f32 to vector<8x16xf32>
    %47 = arith.subf %45, %46 : vector<8x16xf32>
    %48 = vector.broadcast %8 : vector<8x1xf32> to vector<8x16xf32>
    %49 = arith.mulf %47, %48 : vector<8x16xf32>
    %50 = vector.shape_cast %49 : vector<8x16xf32> to vector<1x8x16xf32>
    %cst_23 = arith.constant dense<0.000000e+00> : vector<1xf32>
    %51 = vector.multi_reduction <add>, %50, %cst_23 [1, 2] : vector<1x8x16xf32> to vector<1xf32>
    %52 = vector.shape_cast %51 : vector<1xf32> to vector<1x1x1xf32>
    %53 = vector.extract %52[0, 0, 0] : f32 from vector<1x1x1xf32>
    %54 = vector.broadcast %53 : f32 to vector<1x1xf32>
    %c0_24 = arith.constant 0 : index
    %c0_25 = arith.constant 0 : index
    %c0_26 = arith.constant 0 : index
    %55 = vector.load %arg15[%c0_24, %c0_25, %c0_26] : memref<1x1x1xf32, #tpu.memory_space<vmem>>, vector<1x1x1xf32>
    %56 = vector.shape_cast %55 : vector<1x1x1xf32> to vector<1x1xf32>
    %57 = vector.shape_cast %54 : vector<1x1xf32> to vector<1x1x1xf32>
    tpu.vector_store %arg15[%c0_24, %c0_25, %c0_26], %57 {strides = array<i32>} : memref<1x1x1xf32, #tpu.memory_space<vmem>>, vector<1x1x1xf32>,
    %58 = vector.shape_cast %8 : vector<8x1xf32> to vector<1x8x1xf32>
    %cst_27 = arith.constant dense<0.000000e+00> : vector<1xf32>
    %59 = vector.multi_reduction <add>, %58, %cst_27 [1, 2] : vector<1x8x1xf32> to vector<1xf32>
    %60 = vector.shape_cast %59 : vector<1xf32> to vector<1x1x1xf32>
    %61 = vector.extract %60[0, 0, 0] : f32 from vector<1x1x1xf32>
    %62 = vector.broadcast %61 : f32 to vector<1x1xf32>
    %c0_28 = arith.constant 0 : index
    %c0_29 = arith.constant 0 : index
    %c0_30 = arith.constant 0 : index
    %63 = vector.load %arg16[%c0_28, %c0_29, %c0_30] : memref<1x1x1xf32, #tpu.memory_space<vmem>>, vector<1x1x1xf32>
    %64 = vector.shape_cast %63 : vector<1x1x1xf32> to vector<1x1xf32>
    %65 = vector.shape_cast %62 : vector<1x1xf32> to vector<1x1x1xf32>
    tpu.vector_store %arg16[%c0_28, %c0_29, %c0_30], %65 {strides = array<i32>} : memref<1x1x1xf32, #tpu.memory_space<vmem>>, vector<1x1x1xf32>,
    return
  }
  func.func @transform_0(%arg0: i32, %arg1: memref<2xi32, #tpu.memory_space<smem>>) -> (i32, i32, i32) {
    %c0_i32 = arith.constant 0 : i32
    %c0_i32_0 = arith.constant 0 : i32
    %c0_i32_1 = arith.constant 0 : i32
    return %arg0, %c0_i32, %c0_i32_0 : i32, i32, i32
  }
  func.func @transform_1(%arg0: i32, %arg1: memref<2xi32, #tpu.memory_space<smem>>) -> (i32, i32, i32) {
    %c0_i32 = arith.constant 0 : i32
    %c0_i32_0 = arith.constant 0 : i32
    %c0_i32_1 = arith.constant 0 : i32
    return %arg0, %c0_i32, %c0_i32_0 : i32, i32, i32
  }
  func.func @transform_2(%arg0: i32, %arg1: memref<2xi32, #tpu.memory_space<smem>>) -> (i32, i32, i32) {
    %c0_i32 = arith.constant 0 : i32
    %c0_i32_0 = arith.constant 0 : i32
    %c0_i32_1 = arith.constant 0 : i32
    return %arg0, %c0_i32, %c0_i32_0 : i32, i32, i32
  }
  func.func @transform_3(%arg0: i32, %arg1: memref<2xi32, #tpu.memory_space<smem>>) -> (i32, i32, i32) {
    %c0_i32 = arith.constant 0 : i32
    %c0_i32_0 = arith.constant 0 : i32
    %c0_i32_1 = arith.constant 0 : i32
    %c0_i32_2 = arith.constant 0 : i32
    return %c0_i32, %c0_i32_0, %c0_i32_1 : i32, i32, i32
  }
  func.func @transform_4(%arg0: i32, %arg1: memref<2xi32, #tpu.memory_space<smem>>) -> (i32, i32, i32) {
    %c0_i32 = arith.constant 0 : i32
    %c0_i32_0 = arith.constant 0 : i32
    %c0_i32_1 = arith.constant 0 : i32
    %c0_i32_2 = arith.constant 0 : i32
    return %c0_i32, %c0_i32_0, %c0_i32_1 : i32, i32, i32
  }
  func.func @transform_5(%arg0: i32, %arg1: memref<2xi32, #tpu.memory_space<smem>>) -> (i32, i32, i32) {
    %c0_i32 = arith.constant 0 : i32
    %c0_i32_0 = arith.constant 0 : i32
    %c0_i32_1 = arith.constant 0 : i32
    %c0_i32_2 = arith.constant 0 : i32
    return %c0_i32, %c0_i32_0, %c0_i32_1 : i32, i32, i32
  }
  func.func @transform_6(%arg0: i32, %arg1: memref<2xi32, #tpu.memory_space<smem>>) -> (i32, i32, i32) {
    %c0_i32 = arith.constant 0 : i32
    %c0_i32_0 = arith.constant 0 : i32
    %c0_i32_1 = arith.constant 0 : i32
    %c0_i32_2 = arith.constant 0 : i32
    return %c0_i32, %c0_i32_0, %c0_i32_1 : i32, i32, i32
  }
  func.func @transform_7(%arg0: i32, %arg1: memref<2xi32, #tpu.memory_space<smem>>) -> (i32, i32, i32) {
    %c0_i32 = arith.constant 0 : i32
    %c0_i32_0 = arith.constant 0 : i32
    %c0_i32_1 = arith.constant 0 : i32
    %c0_i32_2 = arith.constant 0 : i32
    return %c0_i32, %c0_i32_0, %c0_i32_1 : i32, i32, i32
  }
  func.func @transform_8(%arg0: i32, %arg1: memref<2xi32, #tpu.memory_space<smem>>) -> (i32, i32, i32) {
    %c0_i32 = arith.constant 0 : i32
    %c0_i32_0 = arith.constant 0 : i32
    %c0_i32_1 = arith.constant 0 : i32
    %c0_i32_2 = arith.constant 0 : i32
    return %c0_i32, %c0_i32_0, %c0_i32_1 : i32, i32, i32
  }
  func.func @transform_9(%arg0: i32, %arg1: memref<2xi32, #tpu.memory_space<smem>>) -> (i32, i32) {
    %c0_i32 = arith.constant 0 : i32
    %c0_i32_0 = arith.constant 0 : i32
    %c0_i32_1 = arith.constant 0 : i32
    return %c0_i32, %c0_i32_0 : i32, i32
  }
  func.func @transform_10(%arg0: i32, %arg1: memref<2xi32, #tpu.memory_space<smem>>) -> (i32, i32) {
    %c0_i32 = arith.constant 0 : i32
    %c0_i32_0 = arith.constant 0 : i32
    %c0_i32_1 = arith.constant 0 : i32
    return %c0_i32, %c0_i32_0 : i32, i32
  }
  func.func @transform_11(%arg0: i32, %arg1: memref<2xi32, #tpu.memory_space<smem>>) -> (i32, i32, i32) {
    %c0_i32 = arith.constant 0 : i32
    %c0_i32_0 = arith.constant 0 : i32
    %c0_i32_1 = arith.constant 0 : i32
    return %arg0, %c0_i32, %c0_i32_0 : i32, i32, i32
  }
  func.func @transform_12(%arg0: i32, %arg1: memref<2xi32, #tpu.memory_space<smem>>) -> (i32, i32, i32) {
    %c0_i32 = arith.constant 0 : i32
    %c0_i32_0 = arith.constant 0 : i32
    %c0_i32_1 = arith.constant 0 : i32
    return %arg0, %c0_i32, %c0_i32_0 : i32, i32, i32
  }
  func.func @transform_13(%arg0: i32, %arg1: memref<2xi32, #tpu.memory_space<smem>>) -> (i32, i32, i32) {
    %c0_i32 = arith.constant 0 : i32
    %c0_i32_0 = arith.constant 0 : i32
    %c0_i32_1 = arith.constant 0 : i32
    return %arg0, %c0_i32, %c0_i32_0 : i32, i32, i32
  }
  func.func @transform_14(%arg0: i32, %arg1: memref<2xi32, #tpu.memory_space<smem>>) -> (i32, i32, i32) {
    %c0_i32 = arith.constant 0 : i32
    %c0_i32_0 = arith.constant 0 : i32
    %c0_i32_1 = arith.constant 0 : i32
    return %arg0, %c0_i32, %c0_i32_0 : i32, i32, i32
  }
}

module attributes {stable_mosaic.version = 11 : i64} {
  func.func @_linear_kernel(%arg0: i32, %arg1: memref<16x16xf32, #tpu.memory_space<vmem>>, %arg2: memref<16x128xbf16, #tpu.memory_space<vmem>>, %arg3: memref<1x128xf32, #tpu.memory_space<vmem>>, %arg4: memref<16x128xf32, #tpu.memory_space<vmem>>) attributes {dimension_semantics = [#tpu.dimension_semantics<parallel>], iteration_bounds = array<i64: 1>, scalar_prefetch = 0 : i64, scratch_operands = 0 : i64, tpu.core_type = #tpu.core_type<tc>, window_params = [{transform_indices = @transform_0, window_bounds = array<i64: 16, 16>}, {pipeline_mode = #tpu.pipeline_mode<synchronous>, transform_indices = @transform_1, window_bounds = array<i64: 16, 128>}, {pipeline_mode = #tpu.pipeline_mode<synchronous>, transform_indices = @transform_2, window_bounds = array<i64: 1, 128>}, {transform_indices = @transform_3, window_bounds = array<i64: 16, 128>}]} {
    %c0 = arith.constant 0 : index
    %c0_0 = arith.constant 0 : index
    %0 = vector.load %arg1[%c0, %c0_0] : memref<16x16xf32, #tpu.memory_space<vmem>>, vector<16x16xf32>
    %c0_1 = arith.constant 0 : index
    %c0_2 = arith.constant 0 : index
    %1 = vector.load %arg2[%c0_1, %c0_2] : memref<16x128xbf16, #tpu.memory_space<vmem>>, vector<16x128xbf16>
    %2 = arith.truncf %0 : vector<16x16xf32> to vector<16x16xbf16>
    %cst = arith.constant dense<0.000000e+00> : vector<16x128xf32>
    %3 = tpu.matmul %2, %1, %cst {dimension_numbers = #tpu.dot_dimension_numbers<[1], [0], [0], [1], [0, 0, 1, 1], [], []>} : vector<16x16xbf16>, vector<16x128xbf16>, vector<16x128xf32> -> vector<16x128xf32>
    %c0_3 = arith.constant 0 : index
    %c0_4 = arith.constant 0 : index
    %4 = vector.load %arg3[%c0_3, %c0_4] : memref<1x128xf32, #tpu.memory_space<vmem>>, vector<1x128xf32>
    %5 = vector.broadcast %4 : vector<1x128xf32> to vector<16x128xf32>
    %6 = arith.addf %3, %5 : vector<16x128xf32>
    %c0_5 = arith.constant 0 : index
    %c0_6 = arith.constant 0 : index
    %7 = vector.load %arg4[%c0_5, %c0_6] : memref<16x128xf32, #tpu.memory_space<vmem>>, vector<16x128xf32>
    tpu.vector_store %arg4[%c0_5, %c0_6], %6 {strides = array<i32>} : memref<16x128xf32, #tpu.memory_space<vmem>>, vector<16x128xf32>,
    return
  }
  func.func @transform_0(%arg0: i32) -> (i32, i32) {
    %c0_i32 = arith.constant 0 : i32
    %c0_i32_0 = arith.constant 0 : i32
    return %arg0, %c0_i32 : i32, i32
  }
  func.func @transform_1(%arg0: i32) -> (i32, i32) {
    %c0_i32 = arith.constant 0 : i32
    %c0_i32_0 = arith.constant 0 : i32
    %c0_i32_1 = arith.constant 0 : i32
    return %c0_i32, %c0_i32_0 : i32, i32
  }
  func.func @transform_2(%arg0: i32) -> (i32, i32) {
    %c0_i32 = arith.constant 0 : i32
    %c0_i32_0 = arith.constant 0 : i32
    %c0_i32_1 = arith.constant 0 : i32
    return %c0_i32, %c0_i32_0 : i32, i32
  }
  func.func @transform_3(%arg0: i32) -> (i32, i32) {
    %c0_i32 = arith.constant 0 : i32
    %c0_i32_0 = arith.constant 0 : i32
    return %arg0, %c0_i32 : i32, i32
  }
}

module attributes {stable_mosaic.version = 11 : i64} {
  func.func @_dec_wn_kernel(%arg0: i32, %arg1: memref<2xi32, #tpu.memory_space<smem>>, %arg2: memref<1x32x32xf32, #tpu.memory_space<vmem>>, %arg3: memref<1x32x16xf32, #tpu.memory_space<vmem>>, %arg4: memref<2x16x64xbf16, #tpu.memory_space<vmem>>, %arg5: memref<2x1x64xf32, #tpu.memory_space<vmem>>, %arg6: memref<2x96x64xbf16, #tpu.memory_space<vmem>>, %arg7: memref<2x1x64xf32, #tpu.memory_space<vmem>>, %arg8: memref<2x32x64xbf16, #tpu.memory_space<vmem>>, %arg9: memref<2x1x64xf32, #tpu.memory_space<vmem>>, %arg10: memref<32x64xbf16, #tpu.memory_space<vmem>>, %arg11: memref<1x64xf32, #tpu.memory_space<vmem>>, %arg12: memref<1x32x64xf32, #tpu.memory_space<vmem>>) attributes {dimension_semantics = [#tpu.dimension_semantics<parallel>], iteration_bounds = array<i64: 2>, scalar_prefetch = 1 : i64, scratch_operands = 0 : i64, tpu.core_type = #tpu.core_type<tc>, window_params = [{transform_indices = @transform_0, window_bounds = array<i64: 1, 32, 32>}, {transform_indices = @transform_1, window_bounds = array<i64: 1, 32, 16>}, {pipeline_mode = #tpu.pipeline_mode<synchronous>, transform_indices = @transform_2, window_bounds = array<i64: 2, 16, 64>}, {pipeline_mode = #tpu.pipeline_mode<synchronous>, transform_indices = @transform_3, window_bounds = array<i64: 2, 1, 64>}, {pipeline_mode = #tpu.pipeline_mode<synchronous>, transform_indices = @transform_4, window_bounds = array<i64: 2, 96, 64>}, {pipeline_mode = #tpu.pipeline_mode<synchronous>, transform_indices = @transform_5, window_bounds = array<i64: 2, 1, 64>}, {pipeline_mode = #tpu.pipeline_mode<synchronous>, transform_indices = @transform_6, window_bounds = array<i64: 2, 32, 64>}, {pipeline_mode = #tpu.pipeline_mode<synchronous>, transform_indices = @transform_7, window_bounds = array<i64: 2, 1, 64>}, {pipeline_mode = #tpu.pipeline_mode<synchronous>, transform_indices = @transform_8, window_bounds = array<i64: 32, 64>}, {pipeline_mode = #tpu.pipeline_mode<synchronous>, transform_indices = @transform_9, window_bounds = array<i64: 1, 64>}, {transform_indices = @transform_10, window_bounds = array<i64: 1, 32, 64>}]} {
    %0 = arith.index_cast %arg0 : i32 to index
    %1 = memref.load %arg1[%0] : memref<2xi32, #tpu.memory_space<smem>>
    %2 = tpu.iota {dimensions = array<i32: 0>} : vector<32x1xi32>
    %c1_i32 = arith.constant 1 : i32
    %3 = vector.broadcast %c1_i32 : i32 to vector<32x1xi32>
    %4 = arith.muli %2, %3 : vector<32x1xi32>
    %5 = vector.broadcast %1 : i32 to vector<32x1xi32>
    %6 = arith.cmpi slt, %4, %5 : vector<32x1xi32>
    %7 = arith.extui %6 : vector<32x1xi1> to vector<32x1xi32>
    %8 = arith.sitofp %7 : vector<32x1xi32> to vector<32x1xf32>
    %c0 = arith.constant 0 : index
    %c0_0 = arith.constant 0 : index
    %c0_1 = arith.constant 0 : index
    %9 = vector.load %arg2[%c0, %c0_0, %c0_1] : memref<1x32x32xf32, #tpu.memory_space<vmem>>, vector<1x32x32xf32>
    %10 = vector.shape_cast %9 : vector<1x32x32xf32> to vector<32x32xf32>
    %11 = vector.broadcast %8 : vector<32x1xf32> to vector<32x32xf32>
    %12 = arith.mulf %10, %11 : vector<32x32xf32>
    %c0_2 = arith.constant 0 : index
    %c0_3 = arith.constant 0 : index
    %c0_4 = arith.constant 0 : index
    %13 = vector.load %arg3[%c0_2, %c0_3, %c0_4] : memref<1x32x16xf32, #tpu.memory_space<vmem>>, vector<1x32x16xf32>
    %14 = vector.shape_cast %13 : vector<1x32x16xf32> to vector<32x16xf32>
    %cst = arith.constant 0.000000e+00 : f32
    %15 = vector.broadcast %cst : f32 to vector<1x32xf32>
    %cst_5 = arith.constant 0.000000e+00 : f32
    %16 = vector.broadcast %cst_5 : f32 to vector<32x32xf32>
    %c0_i32 = arith.constant 0 : i32
    %c2_i32 = arith.constant 2 : i32
    %17 = arith.addi %c0_i32, %c2_i32 : i32
    %c1_i32_6 = arith.constant 1 : i32
    %18:2 = scf.for %arg13 = %c0_i32 to %17 step %c1_i32_6 iter_args(%arg14 = %12, %arg15 = %16) -> (vector<32x32xf32>, vector<32x32xf32>)  : i32 {
      %30 = vector.extract_strided_slice %arg14 {offsets = [0, 0], sizes = [31, 32], strides = [1, 1]} : vector<32x32xf32> to vector<31x32xf32>
      %31 = tpu.concatenate %15, %30 in 0 : vector<1x32xf32>, vector<31x32xf32> -> vector<32x32xf32>
      %32 = vector.extract_strided_slice %arg14 {offsets = [1, 0], sizes = [31, 32], strides = [1, 1]} : vector<32x32xf32> to vector<31x32xf32>
      %33 = tpu.concatenate %32, %15 in 0 : vector<31x32xf32>, vector<1x32xf32> -> vector<32x32xf32>
      %34 = tpu.concatenate %31, %arg14, %33 in 1 : vector<32x32xf32>, vector<32x32xf32>, vector<32x32xf32> -> vector<32x96xf32>
      %35 = arith.index_cast %arg13 : i32 to index
      %c0_16 = arith.constant 0 : index
      %c0_17 = arith.constant 0 : index
      %36 = vector.load %arg6[%35, %c0_16, %c0_17] : memref<2x96x64xbf16, #tpu.memory_space<vmem>>, vector<1x96x64xbf16>
      %37 = vector.shape_cast %36 : vector<1x96x64xbf16> to vector<96x64xbf16>
      %38 = arith.truncf %34 : vector<32x96xf32> to vector<32x96xbf16>
      %cst_18 = arith.constant dense<0.000000e+00> : vector<32x64xf32>
      %39 = tpu.matmul %38, %37, %cst_18 {dimension_numbers = #tpu.dot_dimension_numbers<[1], [0], [0], [1], [0, 0, 1, 1], [], []>} : vector<32x96xbf16>, vector<96x64xbf16>, vector<32x64xf32> -> vector<32x64xf32>
      %40 = arith.index_cast %arg13 : i32 to index
      %c0_19 = arith.constant 0 : index
      %c0_20 = arith.constant 0 : index
      %41 = vector.load %arg7[%40, %c0_19, %c0_20] : memref<2x1x64xf32, #tpu.memory_space<vmem>>, vector<1x1x64xf32>
      %42 = vector.shape_cast %41 : vector<1x1x64xf32> to vector<1x64xf32>
      %43 = vector.broadcast %42 : vector<1x64xf32> to vector<32x64xf32>
      %44 = arith.addf %39, %43 : vector<32x64xf32>
      %45 = arith.index_cast %arg13 : i32 to index
      %c0_21 = arith.constant 0 : index
      %c0_22 = arith.constant 0 : index
      %46 = vector.load %arg4[%45, %c0_21, %c0_22] : memref<2x16x64xbf16, #tpu.memory_space<vmem>>, vector<1x16x64xbf16>
      %47 = vector.shape_cast %46 : vector<1x16x64xbf16> to vector<16x64xbf16>
      %48 = arith.truncf %14 : vector<32x16xf32> to vector<32x16xbf16>
      %cst_23 = arith.constant dense<0.000000e+00> : vector<32x64xf32>
      %49 = tpu.matmul %48, %47, %cst_23 {dimension_numbers = #tpu.dot_dimension_numbers<[1], [0], [0], [1], [0, 0, 1, 1], [], []>} : vector<32x16xbf16>, vector<16x64xbf16>, vector<32x64xf32> -> vector<32x64xf32>
      %50 = arith.index_cast %arg13 : i32 to index
      %c0_24 = arith.constant 0 : index
      %c0_25 = arith.constant 0 : index
      %51 = vector.load %arg5[%50, %c0_24, %c0_25] : memref<2x1x64xf32, #tpu.memory_space<vmem>>, vector<1x1x64xf32>
      %52 = vector.shape_cast %51 : vector<1x1x64xf32> to vector<1x64xf32>
      %53 = vector.broadcast %52 : vector<1x64xf32> to vector<32x64xf32>
      %54 = arith.addf %49, %53 : vector<32x64xf32>
      %55 = arith.addf %44, %54 : vector<32x64xf32>
      %56 = vector.extract_strided_slice %55 {offsets = [0, 0], sizes = [32, 32], strides = [1, 1]} : vector<32x64xf32> to vector<32x32xf32>
      %57 = math.tanh %56 : vector<32x32xf32>
      %58 = vector.extract_strided_slice %55 {offsets = [0, 32], sizes = [32, 32], strides = [1, 1]} : vector<32x64xf32> to vector<32x32xf32>
      %59 = arith.negf %58 : vector<32x32xf32>
      %60 = math.exp %59 : vector<32x32xf32>
      %cst_26 = arith.constant 1.000000e+00 : f32
      %61 = vector.broadcast %cst_26 : f32 to vector<32x32xf32>
      %62 = arith.addf %61, %60 : vector<32x32xf32>
      %63 = arith.divf %61, %62 : vector<32x32xf32>
      %64 = arith.mulf %57, %63 : vector<32x32xf32>
      %65 = arith.index_cast %arg13 : i32 to index
      %c0_27 = arith.constant 0 : index
      %c0_28 = arith.constant 0 : index
      %66 = vector.load %arg8[%65, %c0_27, %c0_28] : memref<2x32x64xbf16, #tpu.memory_space<vmem>>, vector<1x32x64xbf16>
      %67 = vector.shape_cast %66 : vector<1x32x64xbf16> to vector<32x64xbf16>
      %68 = arith.truncf %64 : vector<32x32xf32> to vector<32x32xbf16>
      %cst_29 = arith.constant dense<0.000000e+00> : vector<32x64xf32>
      %69 = tpu.matmul %68, %67, %cst_29 {dimension_numbers = #tpu.dot_dimension_numbers<[1], [0], [0], [1], [0, 0, 1, 1], [], []>} : vector<32x32xbf16>, vector<32x64xbf16>, vector<32x64xf32> -> vector<32x64xf32>
      %70 = arith.index_cast %arg13 : i32 to index
      %c0_30 = arith.constant 0 : index
      %c0_31 = arith.constant 0 : index
      %71 = vector.load %arg9[%70, %c0_30, %c0_31] : memref<2x1x64xf32, #tpu.memory_space<vmem>>, vector<1x1x64xf32>
      %72 = vector.shape_cast %71 : vector<1x1x64xf32> to vector<1x64xf32>
      %73 = vector.broadcast %72 : vector<1x64xf32> to vector<32x64xf32>
      %74 = arith.addf %69, %73 : vector<32x64xf32>
      %75 = vector.extract_strided_slice %74 {offsets = [0, 0], sizes = [32, 32], strides = [1, 1]} : vector<32x64xf32> to vector<32x32xf32>
      %76 = arith.addf %arg14, %75 : vector<32x32xf32>
      %77 = vector.broadcast %8 : vector<32x1xf32> to vector<32x32xf32>
      %78 = arith.mulf %76, %77 : vector<32x32xf32>
      %79 = vector.extract_strided_slice %74 {offsets = [0, 32], sizes = [32, 32], strides = [1, 1]} : vector<32x64xf32> to vector<32x32xf32>
      %80 = arith.addf %arg15, %79 : vector<32x32xf32>
      scf.yield %78, %80 : vector<32x32xf32>, vector<32x32xf32>
    }
    %c2_i32_7 = arith.constant 2 : i32
    %19 = vector.broadcast %8 : vector<32x1xf32> to vector<32x32xf32>
    %20 = arith.mulf %18#1, %19 : vector<32x32xf32>
    %c0_8 = arith.constant 0 : index
    %c0_9 = arith.constant 0 : index
    %21 = vector.load %arg10[%c0_8, %c0_9] : memref<32x64xbf16, #tpu.memory_space<vmem>>, vector<32x64xbf16>
    %22 = arith.truncf %20 : vector<32x32xf32> to vector<32x32xbf16>
    %cst_10 = arith.constant dense<0.000000e+00> : vector<32x64xf32>
    %23 = tpu.matmul %22, %21, %cst_10 {dimension_numbers = #tpu.dot_dimension_numbers<[1], [0], [0], [1], [0, 0, 1, 1], [], []>} : vector<32x32xbf16>, vector<32x64xbf16>, vector<32x64xf32> -> vector<32x64xf32>
    %c0_11 = arith.constant 0 : index
    %c0_12 = arith.constant 0 : index
    %24 = vector.load %arg11[%c0_11, %c0_12] : memref<1x64xf32, #tpu.memory_space<vmem>>, vector<1x64xf32>
    %25 = vector.broadcast %24 : vector<1x64xf32> to vector<32x64xf32>
    %26 = arith.addf %23, %25 : vector<32x64xf32>
    %c0_13 = arith.constant 0 : index
    %c0_14 = arith.constant 0 : index
    %c0_15 = arith.constant 0 : index
    %27 = vector.load %arg12[%c0_13, %c0_14, %c0_15] : memref<1x32x64xf32, #tpu.memory_space<vmem>>, vector<1x32x64xf32>
    %28 = vector.shape_cast %27 : vector<1x32x64xf32> to vector<32x64xf32>
    %29 = vector.shape_cast %26 : vector<32x64xf32> to vector<1x32x64xf32>
    tpu.vector_store %arg12[%c0_13, %c0_14, %c0_15], %29 {strides = array<i32>} : memref<1x32x64xf32, #tpu.memory_space<vmem>>, vector<1x32x64xf32>,
    return
  }
  func.func @transform_0(%arg0: i32, %arg1: memref<2xi32, #tpu.memory_space<smem>>) -> (i32, i32, i32) {
    %c0_i32 = arith.constant 0 : i32
    %c0_i32_0 = arith.constant 0 : i32
    %c0_i32_1 = arith.constant 0 : i32
    return %arg0, %c0_i32, %c0_i32_0 : i32, i32, i32
  }
  func.func @transform_1(%arg0: i32, %arg1: memref<2xi32, #tpu.memory_space<smem>>) -> (i32, i32, i32) {
    %c0_i32 = arith.constant 0 : i32
    %c0_i32_0 = arith.constant 0 : i32
    %c0_i32_1 = arith.constant 0 : i32
    return %arg0, %c0_i32, %c0_i32_0 : i32, i32, i32
  }
  func.func @transform_2(%arg0: i32, %arg1: memref<2xi32, #tpu.memory_space<smem>>) -> (i32, i32, i32) {
    %c0_i32 = arith.constant 0 : i32
    %c0_i32_0 = arith.constant 0 : i32
    %c0_i32_1 = arith.constant 0 : i32
    %c0_i32_2 = arith.constant 0 : i32
    return %c0_i32, %c0_i32_0, %c0_i32_1 : i32, i32, i32
  }
  func.func @transform_3(%arg0: i32, %arg1: memref<2xi32, #tpu.memory_space<smem>>) -> (i32, i32, i32) {
    %c0_i32 = arith.constant 0 : i32
    %c0_i32_0 = arith.constant 0 : i32
    %c0_i32_1 = arith.constant 0 : i32
    %c0_i32_2 = arith.constant 0 : i32
    return %c0_i32, %c0_i32_0, %c0_i32_1 : i32, i32, i32
  }
  func.func @transform_4(%arg0: i32, %arg1: memref<2xi32, #tpu.memory_space<smem>>) -> (i32, i32, i32) {
    %c0_i32 = arith.constant 0 : i32
    %c0_i32_0 = arith.constant 0 : i32
    %c0_i32_1 = arith.constant 0 : i32
    %c0_i32_2 = arith.constant 0 : i32
    return %c0_i32, %c0_i32_0, %c0_i32_1 : i32, i32, i32
  }
  func.func @transform_5(%arg0: i32, %arg1: memref<2xi32, #tpu.memory_space<smem>>) -> (i32, i32, i32) {
    %c0_i32 = arith.constant 0 : i32
    %c0_i32_0 = arith.constant 0 : i32
    %c0_i32_1 = arith.constant 0 : i32
    %c0_i32_2 = arith.constant 0 : i32
    return %c0_i32, %c0_i32_0, %c0_i32_1 : i32, i32, i32
  }
  func.func @transform_6(%arg0: i32, %arg1: memref<2xi32, #tpu.memory_space<smem>>) -> (i32, i32, i32) {
    %c0_i32 = arith.constant 0 : i32
    %c0_i32_0 = arith.constant 0 : i32
    %c0_i32_1 = arith.constant 0 : i32
    %c0_i32_2 = arith.constant 0 : i32
    return %c0_i32, %c0_i32_0, %c0_i32_1 : i32, i32, i32
  }
  func.func @transform_7(%arg0: i32, %arg1: memref<2xi32, #tpu.memory_space<smem>>) -> (i32, i32, i32) {
    %c0_i32 = arith.constant 0 : i32
    %c0_i32_0 = arith.constant 0 : i32
    %c0_i32_1 = arith.constant 0 : i32
    %c0_i32_2 = arith.constant 0 : i32
    return %c0_i32, %c0_i32_0, %c0_i32_1 : i32, i32, i32
  }
  func.func @transform_8(%arg0: i32, %arg1: memref<2xi32, #tpu.memory_space<smem>>) -> (i32, i32) {
    %c0_i32 = arith.constant 0 : i32
    %c0_i32_0 = arith.constant 0 : i32
    %c0_i32_1 = arith.constant 0 : i32
    return %c0_i32, %c0_i32_0 : i32, i32
  }
  func.func @transform_9(%arg0: i32, %arg1: memref<2xi32, #tpu.memory_space<smem>>) -> (i32, i32) {
    %c0_i32 = arith.constant 0 : i32
    %c0_i32_0 = arith.constant 0 : i32
    %c0_i32_1 = arith.constant 0 : i32
    return %c0_i32, %c0_i32_0 : i32, i32
  }
  func.func @transform_10(%arg0: i32, %arg1: memref<2xi32, #tpu.memory_space<smem>>) -> (i32, i32, i32) {
    %c0_i32 = arith.constant 0 : i32
    %c0_i32_0 = arith.constant 0 : i32
    %c0_i32_1 = arith.constant 0 : i32
    return %arg0, %c0_i32, %c0_i32_0 : i32, i32, i32
  }
}

</mosaic_0001>

<bundles_post_ra>
// kernel: fvae_forward.6
= control target key start
LH: loop header
LB: loop body
LE: loop exit
PB: predicated region body
PF: predicated region fallthrough
CT: control target
= control target key end

     0   :  { %vm99_vm0 = vcmask 130048   ;;  %s206_s1 = inlined_call_operand.vmem [shape: bf16[128,16], index: 1, kind: input, shape index: {}]   ;;  %s207_s2 = inlined_call_operand.vmem [shape: f32[1,16], index: 2, kind: input, shape index: {}]   ;;  %s208_s0 = inlined_call_operand.vmem [shape: f32[16,128], index: 0, kind: input, shape index: {}]   ;;  %s209_s3 = inlined_call_operand.vmem [shape: f32[16,16], index: 3, kind: output, shape index: {}]  }
   0x1   :  { %v145_v0 = vld [vmem:[%s206_s1 + $0x38] sm:$0xff]  ;;  %v144_v1 = vld [vmem:[%s206_s1 + $0x30] sm:$0xff]  ;;  %v143_v2 = vld [vmem:[%s206_s1 + $0x28] sm:$0xff] }
   0x2   :  { %85 = vmatpush.bf16.msra.mxu0 %v145_v0  ;;  %v142_v3 = vld [vmem:[%s206_s1 + $0x20] sm:$0xff]  ;;  %v141_v4 = vld [vmem:[%s206_s1 + $0x18] sm:$0xff]  ;;  %v140_v5 = vld [vmem:[%s206_s1 + $0x10] sm:$0xff] }
   0x3   :  { %v139_v6 = vld [vmem:[%s206_s1 + $0x8] sm:$0xff]  ;;  %v138_v7 = vld [vmem:[%s206_s1] sm:$0xff] }
   0x4   :  { %v14_v8 = vld [vmem:[%s208_s0] sm:$0xff]  ;;  %v15_v9 = vld [vmem:[%s208_s0 + $0x8] sm:$0xff] }
   0x5   :  { %v32_v10 = vpack.c.bf16 %v15_v9, %v14_v8  ;;  %v146_v11 = vld [vmem:[%s207_s2] ss:$0 sm:$0xff] }
   0x6   :  { %86 = vmatpush.bf16.msra.mxu0 %v144_v1 }
   0xa   :  { %87 = vmatpush.bf16.msra.mxu0 %v143_v2 }
   0xe   :  { %88 = vmatpush.bf16.msra.mxu0 %v142_v3 }
  0x12   :  { %89 = vmatpush.bf16.msra.mxu0 %v141_v4 }
  0x16   :  { %90 = vmatpush.bf16.msra.mxu0 %v140_v5 }
  0x1a   :  { %91 = vmatpush.bf16.msra.mxu0 %v139_v6 }
  0x1e   :  { %92 = vmatpush.bf16.msra.mxu0 %v138_v7 }
  0x21   :  { %93 = vmatmul.bf16.vlgmr.msra.gmra.mxu0 %v32_v10 }
  0x9e   :  { %v94_v12 = vpop.f32.mrf.mxu0 }
  0x9f   :  { %v95_v13 = vadd.f32 %v146_v11, %v94_v12 }
  0xa1   :  { %100 = vst.msk [vmem:[%s209_s3] sm:$0xff] %vm99_vm0, %v95_v13 }
  0xa6   :  { %v96_v14 = vpop.f32.mrf.mxu0 }
  0xa7   :  { %v97_v15 = vadd.f32 %v146_v11, %v96_v14 }
  0xa9   :  { %101 = vst.msk [vmem:[%s209_s3 + $0x8] sm:$0xff] %vm99_vm0, %v97_v15 }

// kernel: fvae_forward.5
= control target key start
LH: loop header
LB: loop body
LE: loop exit
PB: predicated region body
PF: predicated region fallthrough
CT: control target
= control target key end

     0   :  { %vm342_vm0 = vcmask 261120   ;;  %s659_s1 = inlined_call_operand.vmem [shape: bf16[512,32], index: 1, kind: input, shape index: {}]   ;;  %s660_s2 = inlined_call_operand.vmem [shape: f32[1,32], index: 2, kind: input, shape index: {}]   ;;  %s661_s0 = inlined_call_operand.vmem [shape: f32[16,512], index: 0, kind: input, shape index: {}]   ;;  %s662_s3 = inlined_call_operand.vmem [shape: f32[16,32], index: 3, kind: output, shape index: {}]  }
   0x1   :  { %v484_v0 = vld [vmem:[%s659_s1 + $0x38] sm:$0xff]  ;;  %v483_v4 = vld [vmem:[%s659_s1 + $0x30] sm:$0xff]  ;;  %v482_v8 = vld [vmem:[%s659_s1 + $0x28] sm:$0xff] }
   0x2   :  { %v492_v1 = vld [vmem:[%s659_s1 + $0x78] sm:$0xff]  ;;  %286 = vmatpush.bf16.msra.mxu0 %v484_v0  ;;  %v491_v5 = vld [vmem:[%s659_s1 + $0x70] sm:$0xff]  ;;  %v490_v9 = vld [vmem:[%s659_s1 + $0x68] sm:$0xff] }
   0x3   :  { %v500_v2 = vld [vmem:[%s659_s1 + $0xb8] sm:$0xff]  ;;  %300 = vmatpush.bf16.msra.mxu1 %v492_v1  ;;  %v499_v6 = vld [vmem:[%s659_s1 + $0xb0] sm:$0xff]  ;;  %v498_v10 = vld [vmem:[%s659_s1 + $0xa8] sm:$0xff] }
   0x4   :  { %v508_v3 = vld [vmem:[%s659_s1 + $0xf8] sm:$0xff]  ;;  %314 = vmatpush.bf16.msra.mxu2 %v500_v2  ;;  %v507_v7 = vld [vmem:[%s659_s1 + $0xf0] sm:$0xff]  ;;  %v506_v11 = vld [vmem:[%s659_s1 + $0xe8] sm:$0xff] }
   0x5   :  { %328 = vmatpush.bf16.msra.mxu3 %v508_v3  ;;  %v481_v12 = vld [vmem:[%s659_s1 + $0x20] sm:$0xff]  ;;  %v480_v16 = vld [vmem:[%s659_s1 + $0x18] sm:$0xff]  ;;  %v479_v20 = vld [vmem:[%s659_s1 + $0x10] sm:$0xff] }
   0x6   :  { %287 = vmatpush.bf16.msra.mxu0 %v483_v4  ;;  %v489_v13 = vld [vmem:[%s659_s1 + $0x60] sm:$0xff]  ;;  %v488_v17 = vld [vmem:[%s659_s1 + $0x58] sm:$0xff]  ;;  %v487_v21 = vld [vmem:[%s659_s1 + $0x50] sm:$0xff] }
   0x7   :  { %301 = vmatpush.bf16.msra.mxu1 %v491_v5  ;;  %v497_v14 = vld [vmem:[%s659_s1 + $0xa0] sm:$0xff]  ;;  %v496_v18 = vld [vmem:[%s659_s1 + $0x98] sm:$0xff]  ;;  %v495_v22 = vld [vmem:[%s659_s1 + $0x90] sm:$0xff] }
   0x8   :  { %315 = vmatpush.bf16.msra.mxu2 %v499_v6  ;;  %v505_v15 = vld [vmem:[%s659_s1 + $0xe0] sm:$0xff]  ;;  %v504_v19 = vld [vmem:[%s659_s1 + $0xd8] sm:$0xff]  ;;  %v503_v23 = vld [vmem:[%s659_s1 + $0xd0] sm:$0xff] }
   0x9   :  { %329 = vmatpush.bf16.msra.mxu3 %v507_v7  ;;  %v478_v24 = vld [vmem:[%s659_s1 + $0x8] sm:$0xff]  ;;  %v477_v28 = vld [vmem:[%s659_s1] sm:$0xff]  ;;  %v16_v36 = vld [vmem:[%s661_s0 + $0x10] sm:$0xff] }
   0xa   :  { %288 = vmatpush.bf16.msra.mxu0 %v482_v8  ;;  %v486_v25 = vld [vmem:[%s659_s1 + $0x48] sm:$0xff]  ;;  %v485_v29 = vld [vmem:[%s659_s1 + $0x40] sm:$0xff]  ;;  %v20_v37 = vld [vmem:[%s661_s0 + $0x30] sm:$0xff] }
   0xb   :  { %302 = vmatpush.bf16.msra.mxu1 %v490_v9  ;;  %v494_v26 = vld [vmem:[%s659_s1 + $0x88] sm:$0xff]  ;;  %v493_v30 = vld [vmem:[%s659_s1 + $0x80] sm:$0xff]  ;;  %v17_v38 = vld [vmem:[%s661_s0 + $0x18] sm:$0xff]  ;;  %v88_v42 = vpack.c.bf16 %v20_v37, %v16_v36 }
   0xc   :  { %316 = vmatpush.bf16.msra.mxu2 %v498_v10  ;;  %v502_v27 = vld [vmem:[%s659_s1 + $0xc8] sm:$0xff]  ;;  %v501_v31 = vld [vmem:[%s659_s1 + $0xc0] sm:$0xff]  ;;  %v21_v39 = vld [vmem:[%s661_s0 + $0x38] sm:$0xff] }
   0xd   :  { %330 = vmatpush.bf16.msra.mxu3 %v506_v11  ;;  %v14_v32 = vld [vmem:[%s661_s0] sm:$0xff]  ;;  %v15_v34 = vld [vmem:[%s661_s0 + $0x8] sm:$0xff]  ;;  %v89_v43 = vpack.c.bf16 %v21_v39, %v17_v38 }
   0xe   :  { %289 = vmatpush.bf16.msra.mxu0 %v481_v12  ;;  %v18_v33 = vld [vmem:[%s661_s0 + $0x20] sm:$0xff]  ;;  %v19_v35 = vld [vmem:[%s661_s0 + $0x28] sm:$0xff] }
   0xf   :  { %303 = vmatpush.bf16.msra.mxu1 %v489_v13  ;;  %v86_v40 = vpack.c.bf16 %v18_v33, %v14_v32  ;;  %v87_v41 = vpack.c.bf16 %v19_v35, %v15_v34  ;;  %v509_v44 = vld [vmem:[%s660_s2] ss:$0 sm:$0xff] }
  0x10   :  { %317 = vmatpush.bf16.msra.mxu2 %v497_v14 }
  0x11   :  { %331 = vmatpush.bf16.msra.mxu3 %v505_v15 }
  0x12   :  { %290 = vmatpush.bf16.msra.mxu0 %v480_v16 }
  0x13   :  { %304 = vmatpush.bf16.msra.mxu1 %v488_v17 }
  0x14   :  { %318 = vmatpush.bf16.msra.mxu2 %v496_v18 }
  0x15   :  { %332 = vmatpush.bf16.msra.mxu3 %v504_v19 }
  0x16   :  { %291 = vmatpush.bf16.msra.mxu0 %v479_v20 }
  0x17   :  { %305 = vmatpush.bf16.msra.mxu1 %v487_v21 }
  0x18   :  { %319 = vmatpush.bf16.msra.mxu2 %v495_v22 }
  0x19   :  { %333 = vmatpush.bf16.msra.mxu3 %v503_v23 }
  0x1a   :  { %292 = vmatpush.bf16.msra.mxu0 %v478_v24 }
  0x1b   :  { %306 = vmatpush.bf16.msra.mxu1 %v486_v25 }
  0x1c   :  { %320 = vmatpush.bf16.msra.mxu2 %v494_v26 }
  0x1d   :  { %334 = vmatpush.bf16.msra.mxu3 %v502_v27 }
  0x1e   :  { %293 = vmatpush.bf16.msra.mxu0 %v477_v28 }
  0x1f   :  { %307 = vmatpush.bf16.msra.mxu1 %v485_v29 }
  0x20   :  { %321 = vmatpush.bf16.msra.mxu2 %v493_v30 }
  0x21   :  { %335 = vmatpush.bf16.msra.mxu3 %v501_v31  ;;  %294 = vmatmul.bf16.vlgmr.msra.gmra.mxu0 %v86_v40 }
  0x22   :  { %308 = vmatmul.bf16.vlgmr.msra.gmra.mxu1 %v87_v41 }
  0x23   :  { %322 = vmatmul.bf16.vlgmr.msra.gmra.mxu2 %v88_v42 }
  0x24   :  { %336 = vmatmul.bf16.vlgmr.msra.gmra.mxu3 %v89_v43 }
  0x9e   :  { %v295_v45 = vpop.f32.mrf.mxu0 }
  0x9f   :  { %v296_v46 = vadd.f32 %v509_v44, %v295_v45  ;;  %v309_v47 = vpop.f32.mrf.mxu1 }
  0xa1   :  { %v310_v48 = vadd.f32 %v309_v47, %v296_v46 }
  0xa6   :  { %v323_v49 = vpop.f32.mrf.mxu2  ;;  %v297_v52 = vpop.f32.mrf.mxu0 }
  0xa7   :  { %v337_v50 = vpop.f32.mrf.mxu3  ;;  %v324_v51 = vadd.f32 %v323_v49, %v310_v48  ;;  %v298_v54 = vadd.f32 %v509_v44, %v297_v52  ;;  %v311_v55 = vpop.f32.mrf.mxu1 }
  0xa9   :  { %v338_v53 = vadd.f32 %v337_v50, %v324_v51  ;;  %v312_v56 = vadd.f32 %v311_v55, %v298_v54 }
  0xab   :  { %343 = vst.msk [vmem:[%s662_s3] sm:$0xff] %vm342_vm0, %v338_v53 }
  0xae   :  { %v325_v57 = vpop.f32.mrf.mxu2 }
  0xaf   :  { %v326_v58 = vadd.f32 %v325_v57, %v312_v56  ;;  %v339_v59 = vpop.f32.mrf.mxu3 }
  0xb1   :  { %v340_v60 = vadd.f32 %v339_v59, %v326_v58 }
  0xb3   :  { %344 = vst.msk [vmem:[%s662_s3 + $0x8] sm:$0xff] %vm342_vm0, %v340_v60 }

// kernel: fvae_forward.8
= control target key start
LH: loop header
LB: loop body
LE: loop exit
PB: predicated region body
PF: predicated region fallthrough
CT: control target
= control target key end

     0   :  { %vm30_vm0 = vcmask 130048   ;;  %s99_s1 = inlined_call_operand.vmem [shape: bf16[16,128], index: 1, kind: input, shape index: {}]   ;;  %s100_s0 = inlined_call_operand.vmem [shape: f32[16,16], index: 0, kind: input, shape index: {}]   ;;  %s101_s2 = inlined_call_operand.vmem [shape: f32[1,128], index: 2, kind: input, shape index: {}]   ;;  %s102_s3 = inlined_call_operand.vmem [shape: f32[16,128], index: 3, kind: output, shape index: {}]  }
   0x1   :  { %v59_v0 = vld [vmem:[%s99_s1] sm:$0xff]  ;;  %v16_v2 = vld [vmem:[%s100_s0 + $0x8] sm:$0xff] }
   0x2   :  { %v15_v1 = vld [vmem:[%s100_s0] sm:$0xff]  ;;  %41 = vmatpush.bf16.msra.mxu0 %v59_v0 }
   0x3   :  { %v19_v3 = vpack.c.bf16 %v16_v2, %v15_v1  ;;  %v60_v4 = vld [vmem:[%s101_s2] ss:$0 sm:$0xff] }
   0x5   :  { %58 = vmatmul.msk.bf16.vlgmr.msra.gmra.mxu0 %vm30_vm0, %v19_v3 }
  0x82   :  { %v43_v5 = vpop.f32.mrf.mxu0 }
  0x83   :  { %v44_v6 = vadd.f32 %v60_v4, %v43_v5 }
  0x85   :  { %48 = vst [vmem:[%s102_s3] sm:$0xff] %v44_v6 }
  0x8a   :  { %v45_v7 = vpop.f32.mrf.mxu0 }
  0x8b   :  { %v46_v8 = vadd.f32 %v60_v4, %v45_v7 }
  0x8d   :  { %49 = vst [vmem:[%s102_s3 + $0x8] sm:$0xff] %v46_v8 }

// kernel: fvae_forward.7
= control target key start
LH: loop header
LB: loop body
LE: loop exit
PB: predicated region body
PF: predicated region fallthrough
CT: control target
= control target key end

     0   :  { %s1208_s21 = smov [#allocation3]   ;;  %s1455_s0 = inlined_call_operand.vmem [shape: s32[2], index: 0, kind: input, shape index: {}]   ;;  %s1456_s1 = inlined_call_operand.vmem [shape: f32[2,8,32], index: 1, kind: input, shape index: {}]   ;;  %s1457_s2 = inlined_call_operand.vmem [shape: f32[2,8,16], index: 2, kind: input, shape index: {}]   ;;  %s1458_s3 = inlined_call_operand.vmem [shape: f32[2,8,16], index: 3, kind: input, shape index: {}]   ;;  %s1459_s4 = inlined_call_operand.vmem [shape: bf16[2,16,64], index: 4, kind: input, shape index: {}]   ;;  %s1460_s5 = inlined_call_operand.vmem [shape: f32[2,1,64], index: 5, kind: input, shape index: {}]   ;;  %s1461_s6 = inlined_call_operand.vmem [shape: bf16[2,96,64], index: 6, kind: input, shape index: {}]   ;;  %s1462_s7 = inlined_call_operand.vmem [shape: f32[2,1,64], index: 7, kind: input, shape index: {}]   ;;  %s1463_s8 = inlined_call_operand.vmem [shape: bf16[2,32,64], index: 8, kind: input, shape index: {}]   ;;  %s1464_s9 = inlined_call_operand.vmem [shape: f32[2,1,64], index: 9, kind: input, shape index: {}]   ;;  %s1465_s10 = inlined_call_operand.vmem [shape: bf16[32,32], index: 10, kind: input, shape index: {}]   ;;  %s1466_s11 = inlined_call_operand.vmem [shape: f32[1,32], index: 11, kind: input, shape index: {}]   ;;  %s1467_s12 = inlined_call_operand.vmem [shape: f32[2,8,32], index: 12, kind: output, shape index: {0}]   ;;  %s1468_s13 = inlined_call_operand.vmem [shape: f32[2,8,16], index: 13, kind: output, shape index: {1}]   ;;  %s1469_s14 = inlined_call_operand.vmem [shape: f32[2,1,1], index: 14, kind: output, shape index: {2}]   ;;  %s1470_s15 = inlined_call_operand.vmem [shape: f32[2,1,1], index: 15, kind: output, shape index: {3}]  }
   0x1   :  { %1472 = sst [smem:[#allocation6_spill]] %s1456_s1  ;;  %s22_s20 = sshll.u32 %s1455_s0, 4  ;;  %s23_s20 = int_to_ptr.vmem [resolvable:$true] %s22_s20 }
   0x2   :  { %1473 = sst [smem:[#allocation7_spill]] %s1469_s14 }
   0x3   :  { %25 = dma.vmem_to_smem %s23_s20, 16, %s1208_s21, [#allocation2] }
   0x4   :  { %1190 = dma.done.wait [#allocation2], 16 }
   0x5   :  { %1191 = vsyncadd [#allocation2], 4294967280 }
   0x6   :  { %28 = sfence }
   0x7   :  { %s1299_s22 = smov 0  }
   0x8 LB: > { %1474 = sst [smem:[#allocation5_spill]] %s1194_s22  ;;  %s1024_s23 = sadd.s32 4294967295, %s1194_s22   ;;  %s1194_s22 = sphi %s1299_s22, %s34_s22  }
   0x9   : > { %p1028_p0 = scmp.ge.s32.totalorder %s1194_s22, 1  ;;  %p445_p1 = scmp.lt.s32.totalorder %s1194_s22, 3 }
   0xb   : > { %p446_p2 = pnand %p1028_p0, %p445_p1 }
   0xc   : > { %p507_p3 = scmp.lt.s32.totalorder (!%p446_p2), %s1024_s23, 1  ;;  %s534_s0 = sld [smem:[#allocation3 + %s1024_s23]] (!%p446_p2) }
   0xd   : > { %449 = sbr.rel (%p446_p2) target bundleno = 1238 (0x4d6), region = 64  ;;  %s1476_s1 = sld [smem:[#allocation6_spill]] (!%p446_p2) }
  0x12   : > { %v535_v0 = vlaneseq  ;;  %s1482_s23 = smov (!%p507_p3, %s1024_s23), 1  ;;  %v538_v3 = vstv %s534_s0  ;;  %v1209_v6 = vmov 0.0   ;;  %v1345_v9 = vmov 0.0   ;;  %s1349_s0 = smov 0  }
  0x13   : > { %s1310_s24 = sshll.u32 %s1482_s23, 3  ;;  %s532_s16 = scalar_lea.vmem %s1470_s15, %s1482_s23 }
  0x14   : > { %v536_v1 = vshrl.u32 %v535_v0, 7  ;;  %s510_s30 = scalar_lea.vmem %s1476_s1, %s1310_s24  ;;  %s514_s18 = scalar_lea.vmem %s1457_s2, %s1310_s24 }
  0x15   : > { %s518_s21 = scalar_lea.vmem %s1458_s3, %s1310_s24  ;;  %s522_s22 = scalar_lea.vmem %s1467_s12, %s1310_s24  ;;  %v542_v4 = vld [vmem:[%s510_s30] sm:$0xff] }
  0x16   : > { %v537_v2 = vmul.u32 4, %v536_v1  ;;  %v1332_v5 = vld [vmem:[%s514_s18] sm:$0xff]  ;;  %s526_s28 = scalar_lea.vmem %s1468_s13, %s1310_s24 }
  0x18   : > { %vm539_vm0 = vcmp.lt.s32.totalorder %v537_v2, %v538_v3 }
  0x19   : > { %v1342_v7 = vsel %vm539_vm0, 1.0, %v1209_v6 }
  0x1a   : > { %v543_v8 = vmul.f32 %v1342_v7, %v542_v4  }
  0x1b LB: >> { %s1210_s1 = smov 32   ;;  %v558_v10 = vrot.slane %v1202_v8, 1  ;;  %s1092_s14 = smul.u32 48, %s1206_s0  ;;  %vm560_vm1 = vcmask 1046528   ;;  %v652_v17 = vpack.c.bf16 %v1332_v5, %v1332_v5  ;;  %vm664_vm2 = vcmask 130048   ;;  %s1206_s0 = sphi %s1349_s0, %s550_s0   ;;  %v1202_v8 = vphi %v543_v8, %v749_v8   ;;  %v1198_v9 = vphi %v1345_v9, %v1477_v9  }
  0x1c   : >> { %562 = vrot.lane.b32.xlu0 %v1202_v8, %s1210_s1  ;;  %s653_s17 = scalar_lea.vmem %s1460_s5, %s1206_s0  ;;  %s1211_s25 = smov 64   ;;  %v554_v21 = vrot.slane %v1202_v8, 7  ;;  %vm556_vm3 = vcmask 1040384   ;;  %vm569_vm4 = vcmask 261120   ;;  %vm571_vm5 = vcmask 523264  }
  0x1d   : >> { %s575_s20 = scalar_lea.vmem %s1461_s6, %s1092_s14  ;;  %v561_v12 = vsel %vm560_vm1, %v558_v10, 0.0  ;;  %s1099_s26 = sshll.u32 %s1206_s0, 3  ;;  %vm630_vm6 = vcmask 785408   ;;  %v1150_v29 = vld [vmem:[%s653_s17] ss:$0 sm:$0xff] }
  0x1e   : >> { %v1098_v11 = vld [vmem:[%s575_s20 + $0x28] sm:$0xff]  ;;  %v1097_v13 = vld [vmem:[%s575_s20 + $0x20] sm:$0xff]  ;;  %v1096_v14 = vld [vmem:[%s575_s20 + $0x18] sm:$0xff]  ;;  %s649_s27 = scalar_lea.vmem %s1459_s4, %s1099_s26  ;;  %s589_s18 = scalar_lea.vmem %s1462_s7, %s1206_s0  ;;  %v557_v22 = vsel %vm556_vm3, 0.0, %v554_v21 }
  0x1f   : >> { %636 = vmatpush.bf16.msra.mxu0 %v1098_v11  ;;  %v1095_v15 = vld [vmem:[%s575_s20 + $0x10] sm:$0xff]  ;;  %v1100_v16 = vld [vmem:[%s649_s27] sm:$0xff]  ;;  %v1094_v18 = vld [vmem:[%s575_s20 + $0x8] sm:$0xff]  ;;  %s715_s14 = scalar_lea.vmem %s1464_s9, %s1206_s0  ;;  %s1212_s30 = smov 96  }
  0x20   : >> { %675 = vmatpush.bf16.msra.mxu1 %v1100_v16  ;;  %v1093_v19 = vld [vmem:[%s575_s20] sm:$0xff] }
  0x21   : >> { %v1151_v30 = vld [vmem:[%s589_s18] ss:$0 sm:$0xff] }
  0x22   : >> { %v1152_v55 = vld [vmem:[%s715_s14] ss:$0 sm:$0xff] }
  0x23   : >> { %637 = vmatpush.bf16.msra.mxu0 %v1097_v13  ;;  %1067 = vmatmul.msk.bf16.vlgmr.msra.gmra.mxu1 %vm664_vm2, %v652_v17 }
  0x24   : >> { %566 = vrot.lane.b32.xlu0 %v561_v12, %s1211_s25  ;;  %s1101_s25 = sshll.u32 %s1206_s0, 4  ;;  %s550_s0 = sadd.s32 1, %s1206_s0  }
  0x25   : >> { %s1392_s1 = scalar_lea.vmem %s1463_s8, %s1101_s25  ;;  %p547_p4 = scmp.ge.s32.totalorder %s550_s0, 2  }
  0x26   : >> { %v1103_v34 = vld [vmem:[%s1392_s1 + $0x8] sm:$0xff]  ;;  %v1102_v50 = vld [vmem:[%s1392_s1] sm:$0xff]  ;;  %s1213_s26 = smov (%p547_p4), 96   ;;  %vm833_vm11 = vcmask (%p547_p4), 7168   ;;  %s1214_s27 = smov (%p547_p4), 16   ;;  %vm831_vm12 = vcmask (%p547_p4), 0  }
  0x27   : >> { %638 = vmatpush.bf16.msra.mxu0 %v1096_v14  ;;  %741 = vmatpush.bf16.msra.mxu2 %v1103_v34  ;;  %v1105_v62 = vld [vmem:[%s1465_s10 + $0x8] sm:$0xff] (%p547_p4)  ;;  %v1104_v0 = vld [vmem:[%s1465_s10] sm:$0xff] (%p547_p4)  ;;  %v834_v1 = vsel (%p547_p4), %vm833_vm11, %v1342_v7, 0.0  ;;  %s1215_s14 = smov (%p547_p4), 112   ;;  %s1478_s25 = sld [smem:[#allocation7_spill]] (%p547_p4) }
  0x28   : > { %835 = vadd.xlane.f32.xlu2 (%p547_p4), %v834_v1  ;;  %v1159_v3 = vld [vmem:[%s1466_s11] ss:$0 sm:$0xff] (%p547_p4) }
  0x29   : > { %v796_v12 = vld [vmem:[%s518_s21] sm:$0xff] (%p547_p4) }
  0x2b   : >> { %639 = vmatpush.bf16.msra.mxu0 %v1095_v15  ;;  %742 = vmatpush.bf16.msra.mxu2 %v1102_v50 }
  0x2f   : >> { %640 = vmatpush.bf16.msra.mxu0 %v1094_v18 }
  0x33   : >> { %641 = vmatpush.bf16.msra.mxu0 %v1093_v19 }
  0x8e   : >> { %v563_v20 = vpop.permute.xlu0 %562 }
  0x8f   : >> { %v570_v23 = vsel %vm569_vm4, %v557_v22, %v563_v20 }
  0x96   : >> { %v567_v24 = vpop.permute.xlu0 %566 }
  0x97   : >> { %v572_v25 = vsel %vm571_vm5, %v570_v23, %v567_v24 }
  0x98   : >> { %v588_v26 = vpack.c.bf16 %v572_v25, %v572_v25 }
  0x9a   : >> { %1060 = vmatmul.msk.bf16.vlgmr.msra.gmra.mxu0 %vm630_vm6, %v588_v26 }
  0x9b   : > { %786 = vmatpush.bf16.msra.mxu0 (%p547_p4), %v1105_v62  ;;  %v836_v11 = vpop.xlane.xlu2 (%p547_p4), %835 }
  0x9c   : > { %v837_v25 = vrot.slane (%p547_p4), %v836_v11, 4 }
  0x9e   : > { %v838_v26 = vadd.f32 (%p547_p4), %v837_v25, %v836_v11 }
  0x9f   : > { %787 = vmatpush.bf16.msra.mxu0 (%p547_p4), %v1104_v0 }
  0xa0   : >> { %v677_v27 = vpop.f32.mrf.mxu1 }
  0xa1   : >> { %v678_v31 = vadd.f32 %v1150_v29, %v677_v27  ;;  %v839_v27 = vrot.slane (%p547_p4), %v838_v26, 2 }
  0xa8   : >> { %v679_v28 = vpop.f32.mrf.mxu1 }
 0x117   : >> { %v643_v32 = vpop.f32.mrf.mxu0 }
 0x118   : >> { %v644_v33 = vadd.f32 %v1151_v30, %v643_v32 }
 0x11a   : >> { %v681_v35 = vadd.f32 %v678_v31, %v644_v33  ;;  %v840_v31 = vadd.f32 (%p547_p4), %v839_v27, %v838_v26 }
 0x11c   : >> { %v1068_v36 = vmul.f32 -1.442695, %v681_v35  ;;  %v841_v34 = vrot.slane (%p547_p4), %v840_v31, 1 }
 0x11e   : >> { %1153 = vpow2.f32 %v1068_v36 }
 0x11f   : >> { %v645_v37 = vpop.f32.mrf.mxu0 }
 0x124   : >> { %v1154_v38 = vpop.eup %1153 }
 0x125   : >> { %v686_v39 = vadd.f32 1.0, %v1154_v38 }
 0x127   : >> { %1155 = vrcp.f32 %v686_v39  ;;  %v698_v43 = vand.u32 2147483648, %v686_v39  ;;  %v696_v45 = vand.u32 2147483647, %v686_v39  ;;  %vm692_vm8 = vweird.f32 %v686_v39 }
 0x128   : >> { %1157 = vtanh.f32 %v681_v35 }
 0x129   : >> { %v699_v47 = vor.u32 1.1754944e-38, %v698_v43  ;;  %vm697_vm10 = vcmp.eq.f32.partialorder %v696_v45, 8.507059e+37 }
 0x12d   : >> { %v1156_v40 = vpop.eup %1155 }
 0x12e   : >> { %v688_v41 = vmul.f32 %v1156_v40, %v686_v39  ;;  %vm693_vm7 = vweird.f32 %v1156_v40  ;;  %v1158_v51 = vpop.eup %1157 }
 0x12f   : >> { %vm694_vm9 = vmor %vm692_vm8, %vm693_vm7 }
 0x130   : >> { %v689_v42 = vsub.f32 1.0, %v688_v41 }
 0x132   : >> { %v690_v44 = vmul.f32 %v1156_v40, %v689_v42 }
 0x134   : >> { %v691_v46 = vadd.f32 %v1156_v40, %v690_v44 }
 0x136   : >> { %v695_v48 = vsel %vm694_vm9, %v1156_v40, %v691_v46 }
 0x137   : >> { %v700_v49 = vsel %vm697_vm10, %v699_v47, %v695_v48 }
 0x138   : >> { %703 = vrot.lane.b32.xlu1 %v700_v49, %s1212_s30 }
 0x1aa   : >> { %v704_v52 = vpop.permute.xlu1 %703 }
 0x1ab   : >> { %v706_v53 = vmul.f32 %v1158_v51, %v704_v52 }
 0x1ad   : >> { %v714_v54 = vpack.c.bf16 %v706_v53, %v706_v53 }
 0x1af   : >> { %1079 = vmatmul.msk.bf16.vlgmr.msra.gmra.mxu2 %vm569_vm4, %v714_v54 }
 0x232   : >> { %v744_v56 = vpop.f32.mrf.mxu2 }
 0x233   : >> { %v745_v57 = vadd.f32 %v1152_v55, %v744_v56 }
 0x235   : >> { %v748_v58 = vadd.f32 %v1202_v8, %v745_v57  ;;  %v750_v59 = vadd.f32 %v1198_v9, %v745_v57  }
 0x236   : > { %549 = sbr.rel (!%p547_p4) target bundleno = 27 (0x1b), region = 149 }
 0x237   : >> { %v749_v8 = vmul.f32 %v1342_v7, %v748_v58   ;;  %v1477_v9 = vmov %v750_v59  ;;  %v751_v61 = vmul.f32 (%p547_p4), %v1342_v7, %v750_v59 }
 0x239   : > { %v756_v63 = vpack.c.bf16 (%p547_p4), %v751_v61, %v751_v61 }
 0x23a   : >> { %v746_v60 = vpop.f32.mrf.mxu2 }
 0x23b   : > { %762 = vrot.lane.b32.xlu0 %v756_v63, %s1213_s26  ;;  %s1479_s26 = scalar_lea.vmem %s1478_s25, %s1482_s23 }
 0x2ad   : > { %v763_v2 = vpop.permute.xlu0 %762 }
 0x2ae   : > { %1088 = vmatmul.msk.bf16.vlgmr.msra.gmra.mxu0 %vm569_vm4, %v763_v2 }
 0x32b   : > { %v789_v4 = vpop.f32.mrf.mxu0 }
 0x32c   : > { %v790_v5 = vadd.f32 %v1159_v3, %v789_v4 }
 0x32e   : > { %793 = vst.msk [vmem:[%s522_s22] sm:$0xff] %vm569_vm4, %v790_v5  ;;  %v794_v6 = vmul.f32 1.442695, %v790_v5  ;;  %v806_v8 = vmul.f32 %v790_v5, %v790_v5 }
 0x330   : > { %1160 = vpow2.f32 %v794_v6  ;;  %808 = vrot.lane.b32.xlu0 %v806_v8, %s1214_s27 }
 0x333   : > { %v791_v9 = vpop.f32.mrf.mxu0 }
 0x336   : > { %v1161_v10 = vpop.eup %1160 }
 0x337   : > { %798 = vrot.lane.b32.xlu2 %v1161_v10, %s1215_s14  ;;  %v805_v16 = vmul.f32 %v1161_v10, %v1161_v10 }
 0x391   : > { %v799_v13 = vpop.permute.xlu2 %798 }
 0x392   : > { %v801_v14 = vmul.f32 %v799_v13, %v796_v12 }
 0x394   : > { %v802_v15 = vadd.f32 %v801_v14, %v790_v5 }
 0x396   : > { %804 = vst.msk [vmem:[%s526_s28] sm:$0xff] %vm664_vm2, %v802_v15 }
 0x3a2   : > { %v809_v17 = vpop.permute.xlu0 %808 }
 0x3a3   : > { %v811_v18 = vadd.f32 %v809_v17, %v805_v16 }
 0x3a5   : > { %v812_v19 = vmul.f32 0.5, %v811_v18 }
 0x3a7   : > { %v813_v20 = vsub.f32 %v812_v19, %v790_v5 }
 0x3a9   : > { %v1089_v21 = vadd.f32 -0.5, %v813_v20 }
 0x3ab   : > { %v815_v22 = vmul.f32 %v1089_v21, %v1342_v7  ;;  %v842_v7 = vadd.f32 %v841_v34, %v840_v31 }
 0x3ad   : > { %817 = vrot.lane.b32.xlu1 %v815_v22, %s1215_s14 }
 0x41f   : > { %v818_v23 = vpop.permute.xlu1 %817 }
 0x420   : > { %v820_v24 = vsel %vm664_vm2, %v818_v23, 0.0 }
 0x421   : > { %821 = vadd.xlane.f32.xlu1 %v820_v24 }
 0x494   : > { %v822_v28 = vpop.xlane.xlu1 %821 }
 0x495   : > { %v823_v29 = vrot.slane %v822_v28, 4 }
 0x497   : > { %v824_v30 = vadd.f32 %v823_v29, %v822_v28 }
 0x499   : > { %v825_v32 = vrot.slane %v824_v30, 2 }
 0x49b   : > { %v826_v33 = vadd.f32 %v825_v32, %v824_v30 }
 0x49d   : > { %v827_v35 = vrot.slane %v826_v33, 1 }
 0x49f   : > { %v828_v36 = vadd.f32 %v827_v35, %v826_v33 }
 0x4a1   : > { %1106 = vpush %v828_v36 }
 0x4a2   : > { %1108 = vpush %v842_v7 }
 0x4d2   : > { %s1107_s24 = spop %1106 }
 0x4d3   : > { %v830_v37 = vstv %s1107_s24  ;;  %s1109_s21 = spop %1108 }
 0x4d4   : > { %832 = vst.msk [vmem:[%s1479_s26] sm:$0x1] %vm831_vm12, %v830_v37  ;;  %v844_v38 = vstv %s1109_s21 }
 0x4d5   : > { %845 = vst.msk [vmem:[%s532_s16] sm:$0x1] %vm831_vm12, %v844_v38 }
 0x4d6 PF: > { %s1480_s1 = sld [smem:[#allocation5_spill]] }
 0x4dc   : > { %s34_s22 = sadd.s32 1, %s1480_s1  }
 0x4dd   : > { %p31_p5 = scmp.ge.s32.totalorder %s34_s22, 4  }
 0x4df   :  { %33 = sbr.rel (!%p31_p5) target bundleno = 8 (0x8), region = 160 }

// kernel: fvae_forward.9
= control target key start
LH: loop header
LB: loop body
LE: loop exit
PB: predicated region body
PF: predicated region fallthrough
CT: control target
= control target key end

     0   :  { %s1402_s20 = smov [#allocation3]   ;;  %s1790_s0 = inlined_call_operand.vmem [shape: s32[2], index: 0, kind: input, shape index: {}]   ;;  %s1791_s1 = inlined_call_operand.vmem [shape: f32[2,32,32], index: 1, kind: input, shape index: {}]   ;;  %s1792_s2 = inlined_call_operand.vmem [shape: f32[2,32,16], index: 2, kind: input, shape index: {}]   ;;  %s1793_s3 = inlined_call_operand.vmem [shape: bf16[2,16,64], index: 3, kind: input, shape index: {}]   ;;  %s1794_s4 = inlined_call_operand.vmem [shape: f32[2,1,64], index: 4, kind: input, shape index: {}]   ;;  %s1795_s5 = inlined_call_operand.vmem [shape: bf16[2,96,64], index: 5, kind: input, shape index: {}]   ;;  %s1796_s6 = inlined_call_operand.vmem [shape: f32[2,1,64], index: 6, kind: input, shape index: {}]   ;;  %s1797_s7 = inlined_call_operand.vmem [shape: bf16[2,32,64], index: 7, kind: input, shape index: {}]   ;;  %s1798_s8 = inlined_call_operand.vmem [shape: f32[2,1,64], index: 8, kind: input, shape index: {}]   ;;  %s1799_s9 = inlined_call_operand.vmem [shape: bf16[32,64], index: 9, kind: input, shape index: {}]   ;;  %s1800_s10 = inlined_call_operand.vmem [shape: f32[1,64], index: 10, kind: input, shape index: {}]   ;;  %s1801_s11 = inlined_call_operand.hbm [shape: f32[2,32,64], index: 11, kind: output, shape index: {}]  }
   0x1   :  { %s17_s19 = sshll.u32 %s1790_s0, 4  ;;  %s18_s19 = int_to_ptr.vmem [resolvable:$true] %s17_s19 }
   0x2   :  { %20 = dma.vmem_to_smem %s18_s19, 16, %s1402_s20, [#allocation2] }
   0x3   :  { %1344 = dma.done.wait [#allocation2], 16 }
   0x4   :  { %1345 = vsyncadd [#allocation2], 4294967280 }
   0x5   :  { %23 = sfence }
   0x6   :  { %24 = vsyncpa [#allocation5], 0 }
   0x7   :  { %26 = vsyncpa [#allocation5 + $0x1], 0  ;;  %s1473_s21 = smov 0   ;;  %s1475_s22 = smov 0  }
   0x8   :  { %s1477_s23 = smov 0   ;;  %s1479_s24 = smov 0  }
   0x9 LB: > { %s1494_s0 = sadd.s32 4294967295, %s1364_s24   ;;  %s981_s25 = sadd.s32 4294967294, %s1364_s24   ;;  %s1364_s24 = sphi %s1479_s24, %s1813_s24   ;;  %s1360_s23 = sphi %s1477_s23, %s1812_s23   ;;  %s1356_s22 = sphi %s1475_s22, %s1811_s22   ;;  %s1352_s21 = sphi %s1473_s21, %s1810_s21  }
   0xa   : > { %s1498_s26 = sadd.s32 1, %s1364_s24   ;;  %s259_s27 = sadd.s32 1, %s1360_s23 }
   0xb   : > { %s256_s28 = ssub.s32 %s1364_s24, %s1498_s26  ;;  %p269_p0 = scmp.ne.s32.totalorder %s1360_s23, %s1356_s22 }
   0xc   : > { %p257_p1 = scmp.eq.s32.totalorder %s256_s28, 0  ;;  %p270_p2 = scmp.eq.s32.totalorder %s1494_s0, 1 }
   0xd   : > { %p275_p3 = scmp.ne.s32.totalorder %s1356_s22, %s1352_s21  ;;  %p276_p4 = scmp.eq.s32.totalorder %s981_s25, 1 }
   0xe   : > { %s1509_s29 = scalar_select %p257_p1, %s1360_s23, %s259_s27  }
   0xf   : > { %p1511_p5 = por %p270_p2, %p269_p0  ;;  %p1515_p6 = por %p276_p4, %p275_p3 }
  0x10   : > { %p984_p7 = scmp.ge.s32.totalorder %s1364_s24, 1  ;;  %p334_p8 = scmp.lt.s32.totalorder %s1364_s24, 3 }
  0x12   : > { %p335_p9 = pnand %p984_p7, %p334_p8 }
  0x13   : > { %s1802_s13 = sand.u32 (!%p335_p9), 1, %s1356_s22   ;;  %p377_p10 = scmp.lt.s32.totalorder (!%p335_p9), %s1494_s0, 1 }
  0x14   : > { %338 = sbr.rel (%p335_p9) target bundleno = 858 (0x35a), region = 60  ;;  %s1525_s14 = sshll.u32 (!%p335_p9), %s1802_s13, 5 }
  0x15   : > { %s388_s15 = sld [smem:[#allocation3 + %s1494_s0]] (!%p335_p9) }
  0x19   : > { %v389_v0 = vlaneseq  ;;  %s378_s16 = scalar_select %p377_p10, %s1494_s0, 1  ;;  %v1403_v12 = vmov 0.0   ;;  %v1558_v23 = vmov 0.0   ;;  %v1560_v24 = vmov 0.0  }
  0x1a   : > { %v1562_v25 = vmov 0.0   ;;  %v1564_v26 = vmov 0.0  }
  0x1b   : > { %v390_v1 = vshrl.u32 %v389_v0, 7  ;;  %s1060_s17 = sshll.u32 %s378_s16, 5  ;;  %v394_v5 = vstv %s388_s15  ;;  %s1556_s15 = scalar_lea.vmem [#allocation4], %s1525_s14 }
  0x1c   : > { %s381_s20 = scalar_lea.vmem %s1791_s1, %s1060_s17  ;;  %s386_s28 = scalar_lea.vmem %s1792_s2, %s1060_s17 }
  0x1d   : > { %v391_v2 = vadd.s32 8, %v390_v1  ;;  %v392_v3 = vadd.s32 16, %v390_v1  ;;  %v393_v4 = vadd.s32 24, %v390_v1  ;;  %v407_v6 = vld [vmem:[%s381_s20] sm:$0xff]  ;;  %v408_v7 = vld [vmem:[%s381_s20 + $0x8] sm:$0xff]  ;;  %v409_v8 = vld [vmem:[%s381_s20 + $0x10] sm:$0xff]  ;;  %vm395_vm0 = vcmp.lt.s32.totalorder %v390_v1, %v394_v5 }
  0x1e   : > { %v410_v9 = vld [vmem:[%s381_s20 + $0x18] sm:$0xff]  ;;  %v1535_v10 = vld [vmem:[%s386_s28] sm:$0xff]  ;;  %v1537_v11 = vld [vmem:[%s386_s28 + $0x8] sm:$0xff]  ;;  %v1539_v13 = vsel %vm395_vm0, 1.0, %v1403_v12  ;;  %s1574_s16 = smov 0  }
  0x1f   : > { %vm396_vm1 = vcmp.lt.s32.totalorder %v391_v2, %v394_v5  ;;  %vm397_vm2 = vcmp.lt.s32.totalorder %v392_v3, %v394_v5  ;;  %vm398_vm3 = vcmp.lt.s32.totalorder %v393_v4, %v394_v5  ;;  %v1547_v17 = vld [vmem:[%s386_s28 + $0x10] sm:$0xff]  ;;  %v1549_v18 = vld [vmem:[%s386_s28 + $0x18] sm:$0xff]  ;;  %v411_v19 = vmul.f32 %v1539_v13, %v407_v6  }
  0x20   : > { %v1541_v14 = vsel %vm396_vm1, 1.0, %v1403_v12  ;;  %v1543_v15 = vsel %vm397_vm2, 1.0, %v1403_v12  ;;  %v1545_v16 = vsel %vm398_vm3, 1.0, %v1403_v12 }
  0x21   : > { %v412_v20 = vmul.f32 %v1541_v14, %v408_v7   ;;  %v413_v21 = vmul.f32 %v1543_v15, %v409_v8   ;;  %v414_v22 = vmul.f32 %v1545_v16, %v410_v9  }
  0x22 LB: >> { %v1204_v27 = vpack.i.bf16 %v1392_v20, %v1396_v19  ;;  %v1214_v28 = vpack.i.bf16 %v1384_v22, %v1388_v21  ;;  %vm450_vm4 = vcmask 1046528   ;;  %v451_v29 = vrot.slane %v1396_v19, 1  ;;  %s1062_s14 = smul.u32 48, %s1400_s16  ;;  %s1069_s17 = sshll.u32 %s1400_s16, 3  ;;  %s1400_s16 = sphi %s1574_s16, %s424_s16   ;;  %v1396_v19 = vphi %v411_v19, %v782_v19   ;;  %v1392_v20 = vphi %v412_v20, %v783_v20   ;;  %v1388_v21 = vphi %v413_v21, %v784_v21   ;;  %v1384_v22 = vphi %v414_v22, %v785_v22   ;;  %v1380_v26 = vphi %v1564_v26, %v1808_v26   ;;  %v1376_v25 = vphi %v1562_v25, %v1807_v25   ;;  %v1372_v24 = vphi %v1560_v24, %v1806_v24   ;;  %v1368_v23 = vphi %v1558_v23, %v1805_v23  }
  0x23   : >> { %s1404_s18 = smov 32   ;;  %v452_v30 = vrot.slane %v1392_v20, 1  ;;  %v454_v31 = vrot.slane %v1388_v21, 1  ;;  %v456_v32 = vrot.slane %v1384_v22, 1  ;;  %s581_s25 = scalar_lea.vmem %s1793_s3, %s1069_s17  ;;  %v584_v34 = vpack.c.bf16 %v1537_v11, %v1535_v10 }
  0x24   : >> { %1205 = vrot.lane.b32.xlu0 %v1204_v27, %s1404_s18  ;;  %1215 = vrot.lane.b32.xlu1 %v1214_v28, %s1404_s18  ;;  %s1619_s13 = scalar_lea.vmem %s1795_s5, %s1062_s14  ;;  %v1070_v33 = vld [vmem:[%s581_s25] sm:$0xff]  ;;  %s586_s14 = scalar_lea.vmem %s1794_s4, %s1400_s16  ;;  %vm597_vm5 = vcmask 130048   ;;  %v585_v47 = vpack.c.bf16 %v1549_v18, %v1547_v17  ;;  %v438_v49 = vrot.slane %v1396_v19, 7  ;;  %v439_v51 = vrot.slane %v1392_v20, 7 }
  0x25   : >> { %v453_v35 = vsel %vm450_vm4, %v451_v29, %v452_v30  ;;  %v455_v36 = vsel %vm450_vm4, %v452_v30, %v454_v31  ;;  %v457_v37 = vsel %vm450_vm4, %v454_v31, %v456_v32  ;;  %v459_v38 = vsel %vm450_vm4, %v456_v32, 0.0  ;;  %v1068_v39 = vld [vmem:[%s1619_s13 + $0x28] sm:$0xff]  ;;  %611 = vmatpush.bf16.msra.mxu1 %v1070_v33  ;;  %v1067_v41 = vld [vmem:[%s1619_s13 + $0x20] sm:$0xff]  ;;  %s1405_s19 = smov 64   ;;  %v1066_v43 = vld [vmem:[%s1619_s13 + $0x18] sm:$0xff]  ;;  %s512_s27 = scalar_lea.vmem %s1796_s6, %s1400_s16 }
  0x26   : >> { %v1209_v40 = vpack.i.bf16 %v455_v36, %v453_v35  ;;  %562 = vmatpush.bf16.msra.mxu0 %v1068_v39  ;;  %1077 = vmatpush.bf16.msra.mxu3 %v1068_v39  ;;  %v1219_v42 = vpack.i.bf16 %v459_v38, %v457_v37  ;;  %v1065_v44 = vld [vmem:[%s1619_s13 + $0x10] sm:$0xff]  ;;  %v1064_v45 = vld [vmem:[%s1619_s13 + $0x8] sm:$0xff]  ;;  %v1063_v46 = vld [vmem:[%s1619_s13] sm:$0xff]  ;;  %v441_v52 = vrot.slane %v1388_v21, 7  ;;  %v443_v53 = vrot.slane %v1384_v22, 7  ;;  %s736_s25 = scalar_lea.vmem %s1798_s8, %s1400_s16 }
  0x27   : >> { %vm437_vm6 = vcmask 1040384   ;;  %vm485_vm7 = vcmask 261120   ;;  %vm490_vm8 = vcmask 523264   ;;  %vm553_vm9 = vcmask 785408   ;;  %v1224_v32 = vld [vmem:[%s586_s14] ss:$0 sm:$0xff] }
  0x28   : >> { %1027 = vmatmul.msk.bf16.vlgmr.msra.gmra.mxu1 %vm597_vm5, %v584_v34  ;;  %v449_v56 = vsel %vm437_vm6, 0.0, %v438_v49  ;;  %v440_v57 = vsel %vm437_vm6, %v438_v49, %v439_v51  ;;  %v442_v58 = vsel %vm437_vm6, %v439_v51, %v441_v52  ;;  %v444_v63 = vsel %vm437_vm6, %v441_v52, %v443_v53  ;;  %v1225_v33 = vld [vmem:[%s512_s27] ss:$0 sm:$0xff]  ;;  %s1406_s14 = smov 96   ;;  %s1071_s27 = sshll.u32 %s1400_s16, 4 }
  0x29   : >> { %s729_s17 = scalar_lea.vmem %s1797_s7, %s1071_s27  ;;  %s424_s16 = sadd.s32 1, %s1400_s16  }
  0x2a   : >> { %563 = vmatpush.bf16.msra.mxu0 %v1067_v41  ;;  %1078 = vmatpush.bf16.msra.mxu3 %v1067_v41  ;;  %p421_p11 = scmp.ge.s32.totalorder %s424_s16, 2  }
  0x2b   : > { %s1407_s13 = smov (%p421_p11), 96   ;;  %v1251_v18 = vld [vmem:[%s1800_s10] ss:$0 sm:$0xff] (%p421_p11)  ;;  %s866_s20 = sshll.u32 (%p421_p11), %s1556_s15, 4  ;;  %s867_s20 = int_to_ptr.vmem [resolvable:$true] %s866_s20 }
  0x2c   : >> { %1210 = vrot.lane.b32.xlu0 %v1209_v40, %s1405_s19  ;;  %1220 = vrot.lane.b32.xlu1 %v1219_v42, %s1405_s19  ;;  %s1284_s18 = scalar_lea.hbm (%p421_p11), %s1801_s11, 64 }
  0x2e   : >> { %564 = vmatpush.bf16.msra.mxu0 %v1066_v43  ;;  %1079 = vmatpush.bf16.msra.mxu3 %v1066_v43 }
  0x32   : >> { %565 = vmatpush.bf16.msra.mxu0 %v1065_v44  ;;  %1080 = vmatpush.bf16.msra.mxu3 %v1065_v44 }
  0x36   : >> { %566 = vmatpush.bf16.msra.mxu0 %v1064_v45  ;;  %1081 = vmatpush.bf16.msra.mxu3 %v1064_v45 }
  0x38   : >> { %1028 = vmatmul.msk.bf16.gmra.mxu1 %vm597_vm5, %v585_v47 }
  0x3a   : >> { %567 = vmatpush.bf16.msra.mxu0 %v1063_v46  ;;  %1082 = vmatpush.bf16.msra.mxu3 %v1063_v46 }
  0x96   : >> { %v1206_v48 = vpop.permute.xlu0 %1205  ;;  %v1216_v50 = vpop.permute.xlu1 %1215 }
  0x97   : >> { %v1208_v54 = vunpack.i.h.bf16 %v1206_v48  ;;  %v1207_v55 = vunpack.i.l.bf16 %v1206_v48  ;;  %v1218_v59 = vunpack.i.h.bf16 %v1216_v50  ;;  %v1217_v60 = vunpack.i.l.bf16 %v1216_v50 }
  0x99   : >> { %v486_v61 = vsel %vm485_vm7, %v449_v56, %v1207_v55  ;;  %v487_v62 = vsel %vm485_vm7, %v440_v57, %v1208_v54  ;;  %v488_v6 = vsel %vm485_vm7, %v442_v58, %v1217_v60  ;;  %v489_v7 = vsel %vm485_vm7, %v444_v63, %v1218_v59 }
  0x9e   : >> { %v1211_v0 = vpop.permute.xlu0 %1210  ;;  %v1221_v3 = vpop.permute.xlu1 %1220 }
  0x9f   : >> { %v1213_v1 = vunpack.i.h.bf16 %v1211_v0  ;;  %v1212_v2 = vunpack.i.l.bf16 %v1211_v0  ;;  %v1223_v4 = vunpack.i.h.bf16 %v1221_v3  ;;  %v1222_v5 = vunpack.i.l.bf16 %v1221_v3 }
  0xa1   : >> { %v491_v8 = vsel %vm490_vm8, %v486_v61, %v1212_v2  ;;  %v492_v9 = vsel %vm490_vm8, %v487_v62, %v1213_v1  ;;  %v493_v27 = vsel %vm490_vm8, %v488_v6, %v1222_v5  ;;  %v494_v28 = vsel %vm490_vm8, %v489_v7, %v1223_v4 }
  0xa2   : >> { %v510_v12 = vpack.c.bf16 %v492_v9, %v491_v8  ;;  %v511_v29 = vpack.c.bf16 %v494_v28, %v493_v27 }
  0xa4   : >> { %1019 = vmatmul.msk.bf16.vlgmr.msra.gmra.mxu0 %vm553_vm9, %v510_v12  ;;  %1020 = vmatmul.msk.bf16.vlgmr.msra.gmra.mxu3 %vm553_vm9, %v511_v29 }
  0xa5   : >> { %v613_v30 = vpop.f32.mrf.mxu1 }
  0xa6   : >> { %v614_v35 = vadd.f32 %v1224_v32, %v613_v30 }
  0xad   : >> { %v615_v31 = vpop.f32.mrf.mxu1 }
  0xae   : >> { %v616_v44 = vadd.f32 %v1224_v32, %v615_v31 }
  0xb5   : >> { %v618_v37 = vpop.f32.mrf.mxu1 }
  0xb6   : >> { %v619_v40 = vadd.f32 %v1224_v32, %v618_v37 }
  0xbd   : >> { %v620_v50 = vpop.f32.mrf.mxu1 }
  0xbe   : >> { %v621_v54 = vadd.f32 %v1224_v32, %v620_v50 }
 0x121   : >> { %v569_v34 = vpop.f32.mrf.mxu0 }
 0x122   : >> { %v570_v36 = vadd.f32 %v1225_v33, %v569_v34 }
 0x124   : >> { %v1667_v38 = vadd.f32 %v614_v35, %v570_v36 }
 0x126   : >> { %v1029_v39 = vmul.f32 -1.442695, %v1667_v38 }
 0x127   : >> { %v574_v41 = vpop.f32.mrf.mxu3 }
 0x128   : >> { %1227 = vpow2.f32 %v1029_v39  ;;  %v575_v42 = vadd.f32 %v1225_v33, %v574_v41 }
 0x129   : >> { %v571_v43 = vpop.f32.mrf.mxu0 }
 0x12a   : >> { %v572_v45 = vadd.f32 %v1225_v33, %v571_v43  ;;  %v1670_v46 = vadd.f32 %v619_v40, %v575_v42 }
 0x12c   : >> { %v1672_v47 = vadd.f32 %v616_v44, %v572_v45  ;;  %v1031_v48 = vmul.f32 -1.442695, %v1670_v46 }
 0x12e   : >> { %v1228_v49 = vpop.eup %1227  ;;  %v1030_v51 = vmul.f32 -1.442695, %v1672_v47  ;;  %1229 = vpow2.f32 %v1031_v48 }
 0x12f   : >> { %v643_v52 = vadd.f32 1.0, %v1228_v49  ;;  %v576_v53 = vpop.f32.mrf.mxu3 }
 0x130   : >> { %1231 = vpow2.f32 %v1030_v51  ;;  %v577_v55 = vadd.f32 %v1225_v33, %v576_v53 }
 0x131   : >> { %1233 = vrcp.f32 %v643_v52  ;;  %v658_v1 = vand.u32 2147483648, %v643_v52  ;;  %v656_v3 = vand.u32 2147483647, %v643_v52  ;;  %vm652_vm11 = vweird.f32 %v643_v52 }
 0x132   : >> { %v1676_v56 = vadd.f32 %v621_v54, %v577_v55 }
 0x133   : >> { %v659_v9 = vor.u32 1.1754944e-38, %v658_v1  ;;  %vm657_vm13 = vcmp.eq.f32.partialorder %v656_v3, 8.507059e+37 }
 0x134   : >> { %v1230_v57 = vpop.eup %1229  ;;  %v1032_v58 = vmul.f32 -1.442695, %v1676_v56 }
 0x135   : >> { %v645_v60 = vadd.f32 1.0, %v1230_v57 }
 0x136   : >> { %v1232_v59 = vpop.eup %1231  ;;  %1235 = vpow2.f32 %v1032_v58 }
 0x137   : >> { %v1234_v61 = vpop.eup %1233  ;;  %v644_v62 = vadd.f32 1.0, %v1232_v59  ;;  %1237 = vrcp.f32 %v645_v60  ;;  %v688_v31 = vand.u32 2147483648, %v645_v60  ;;  %v686_v34 = vand.u32 2147483647, %v645_v60 }
 0x138   : >> { %v648_v63 = vmul.f32 %v1234_v61, %v643_v52  ;;  %vm653_vm10 = vweird.f32 %v1234_v61  ;;  %vm682_vm0 = vweird.f32 %v645_v60 }
 0x139   : >> { %1239 = vrcp.f32 %v644_v62  ;;  %vm654_vm12 = vmor %vm652_vm11, %vm653_vm10  ;;  %v673_v35 = vand.u32 2147483648, %v644_v62  ;;  %v671_v37 = vand.u32 2147483647, %v644_v62  ;;  %v689_v41 = vor.u32 1.1754944e-38, %v688_v31 }
 0x13a   : >> { %v649_v0 = vsub.f32 1.0, %v648_v63  ;;  %vm667_vm2 = vweird.f32 %v644_v62  ;;  %vm687_vm3 = vcmp.eq.f32.partialorder %v686_v34, 8.507059e+37 }
 0x13b   : >> { %v674_v44 = vor.u32 1.1754944e-38, %v673_v35  ;;  %vm672_vm5 = vcmp.eq.f32.partialorder %v671_v37, 8.507059e+37 }
 0x13c   : >> { %v650_v2 = vmul.f32 %v1234_v61, %v649_v0  ;;  %v1236_v4 = vpop.eup %1235 }
 0x13d   : >> { %v1238_v5 = vpop.eup %1237  ;;  %v646_v6 = vadd.f32 1.0, %v1236_v4 }
 0x13e   : >> { %v651_v7 = vadd.f32 %v1234_v61, %v650_v2  ;;  %v678_v12 = vmul.f32 %v1238_v5, %v645_v60  ;;  %vm683_vm14 = vweird.f32 %v1238_v5  ;;  %v1073_v60 = vld [vmem:[%s729_s17 + $0x8] sm:$0xff] }
 0x13f   : >> { %v1240_v8 = vpop.eup %1239  ;;  %1241 = vrcp.f32 %v646_v6  ;;  %vm684_vm1 = vmor %vm682_vm0, %vm683_vm14  ;;  %v703_v52 = vand.u32 2147483648, %v646_v6  ;;  %v701_v54 = vand.u32 2147483647, %v646_v6  ;;  %vm697_vm9 = vweird.f32 %v646_v6  ;;  %765 = vmatpush.bf16.msra.mxu2 %v1073_v60 }
 0x140   : >> { %v655_v27 = vsel %vm654_vm12, %v1234_v61, %v651_v7  ;;  %v663_v28 = vmul.f32 %v1240_v8, %v644_v62  ;;  %v679_v30 = vsub.f32 1.0, %v678_v12  ;;  %vm668_vm15 = vweird.f32 %v1240_v8  ;;  %v1072_v61 = vld [vmem:[%s729_s17] sm:$0xff]  ;;  %s1076_s17 = sshll.u32 (%p421_p11), %s1494_s0, 5  ;;  %s1809_s0 = sand.u32 (%p421_p11), 1, %s1356_s22  }
 0x141   : >> { %v660_v29 = vsel %vm657_vm13, %v659_v9, %v655_v27  ;;  %vm669_vm4 = vmor %vm667_vm2, %vm668_vm15  ;;  %v704_v57 = vor.u32 1.1754944e-38, %v703_v52  ;;  %vm702_vm11 = vcmp.eq.f32.partialorder %v701_v54, 8.507059e+37  ;;  %1243 = vtanh.f32 %v1667_v38  ;;  %v1226_v12 = vld [vmem:[%s736_s25] ss:$0 sm:$0xff]  ;;  %s865_s19 = scalar_lea.hbm (%p421_p11), %s1801_s11, %s1076_s17  ;;  %s854_s27 = scalar_lea.sflag (%p421_p11), [#allocation5], %s1809_s0 }
 0x142   : >> { %711 = vrot.lane.b32.xlu2 %v660_v29, %s1406_s14  ;;  %v664_v32 = vsub.f32 1.0, %v663_v28  ;;  %v680_v33 = vmul.f32 %v1238_v5, %v679_v30  ;;  %1245 = vtanh.f32 %v1672_v47  ;;  %s868_s25 = sshll.u32 (%p421_p11), %s865_s19, 4  ;;  %s869_s25 = int_to_ptr.hbm [resolvable:$true] %s868_s25 }
 0x143   : >> { %766 = vmatpush.bf16.msra.mxu2 %v1072_v61  ;;  %1247 = vtanh.f32 %v1670_v46 }
 0x144   : >> { %v665_v36 = vmul.f32 %v1240_v8, %v664_v32  ;;  %v681_v39 = vadd.f32 %v1238_v5, %v680_v33  ;;  %1249 = vtanh.f32 %v1676_v56 }
 0x145   : >> { %v1242_v40 = vpop.eup %1241 }
 0x146   : >> { %v666_v42 = vadd.f32 %v1240_v8, %v665_v36  ;;  %v685_v43 = vsel %vm684_vm1, %v1238_v5, %v681_v39  ;;  %v693_v45 = vmul.f32 %v1242_v40, %v646_v6  ;;  %vm698_vm6 = vweird.f32 %v1242_v40 }
 0x147   : >> { %v690_v48 = vsel %vm687_vm3, %v689_v41, %v685_v43  ;;  %vm699_vm10 = vmor %vm697_vm9, %vm698_vm6  ;;  %v1244_v63 = vpop.eup %1243  ;;  %v1075_v43 = vld [vmem:[%s1799_s9 + $0x8] sm:$0xff] (%p421_p11) }
 0x148   : >> { %v670_v49 = vsel %vm669_vm4, %v1240_v8, %v666_v42  ;;  %715 = vrot.lane.b32.xlu0 %v690_v48, %s1406_s14  ;;  %v694_v51 = vsub.f32 1.0, %v693_v45  ;;  %v1246_v0 = vpop.eup %1245  ;;  %835 = vmatpush.bf16.msra.mxu0 (%p421_p11), %v1075_v43  ;;  %v1074_v45 = vld [vmem:[%s1799_s9] sm:$0xff] (%p421_p11) }
 0x149   : >> { %v675_v50 = vsel %vm672_vm5, %v674_v44, %v670_v49  ;;  %v1248_v6 = vpop.eup %1247  ;;  %1083 = vmatpush.bf16.msra.mxu1 (%p421_p11), %v1075_v43 }
 0x14a   : >> { %713 = vrot.lane.b32.xlu2 %v675_v50, %s1406_s14  ;;  %v695_v53 = vmul.f32 %v1242_v40, %v694_v51  ;;  %v1250_v7 = vpop.eup %1249 }
 0x14c   : >> { %v696_v55 = vadd.f32 %v1242_v40, %v695_v53  ;;  %836 = vmatpush.bf16.msra.mxu0 (%p421_p11), %v1074_v45 }
 0x14d   : > { %1084 = vmatpush.bf16.msra.mxu1 (%p421_p11), %v1074_v45 }
 0x14e   : >> { %v700_v58 = vsel %vm699_vm10, %v1242_v40, %v696_v55 }
 0x14f   : >> { %v705_v59 = vsel %vm702_vm11, %v704_v57, %v700_v58 }
 0x150   : >> { %717 = vrot.lane.b32.xlu1 %v705_v59, %s1406_s14 }
 0x19c   : >> { %v712_v62 = vpop.permute.xlu2 %711 }
 0x19d   : >> { %v723_v2 = vmul.f32 %v1244_v63, %v712_v62 }
 0x1a4   : >> { %v714_v1 = vpop.permute.xlu2 %713 }
 0x1a5   : >> { %v724_v3 = vmul.f32 %v1246_v0, %v714_v1 }
 0x1a7   : >> { %v734_v4 = vpack.c.bf16 %v724_v3, %v723_v2 }
 0x1a9   : >> { %1043 = vmatmul.msk.bf16.vlgmr.msra.gmra.mxu2 %vm485_vm7, %v734_v4 }
 0x1ba   : >> { %v716_v5 = vpop.permute.xlu0 %715 }
 0x1bb   : >> { %v725_v38 = vmul.f32 %v1248_v6, %v716_v5 }
 0x1c2   : >> { %v718_v8 = vpop.permute.xlu1 %717 }
 0x1c3   : >> { %v726_v9 = vmul.f32 %v1250_v7, %v718_v8 }
 0x1c5   : >> { %v735_v47 = vpack.c.bf16 %v726_v9, %v725_v38 }
 0x1c7   : >> { %1044 = vmatmul.msk.bf16.gmra.mxu2 %vm485_vm7, %v735_v47 }
 0x22c   : >> { %v768_v27 = vpop.f32.mrf.mxu2 }
 0x22d   : >> { %v769_v28 = vadd.f32 %v1226_v12, %v768_v27 }
 0x22f   : >> { %v778_v46 = vadd.f32 %v1396_v19, %v769_v28  ;;  %v786_v56 = vadd.f32 %v1380_v26, %v769_v28  }
 0x231   : >> { %v782_v19 = vmul.f32 %v1539_v13, %v778_v46   ;;  %v790_v41 = vmul.f32 (%p421_p11), %v1539_v13, %v786_v56 }
 0x234   : >> { %v770_v29 = vpop.f32.mrf.mxu2 }
 0x235   : >> { %v771_v30 = vadd.f32 %v1226_v12, %v770_v29 }
 0x237   : >> { %v779_v31 = vadd.f32 %v1392_v20, %v771_v30  ;;  %v787_v32 = vadd.f32 %v1376_v25, %v771_v30  }
 0x239   : >> { %v783_v20 = vmul.f32 %v1541_v14, %v779_v31   ;;  %v1807_v25 = vmov %v787_v32  ;;  %v791_v42 = vmul.f32 (%p421_p11), %v1541_v14, %v787_v32 }
 0x23b   : > { %v798_v44 = vpack.c.bf16 (%p421_p11), %v791_v42, %v790_v41 }
 0x23d   : > { %806 = vrot.lane.b32.xlu0 (%p421_p11), %v798_v44, %s1407_s13 }
 0x24a   : >> { %v773_v33 = vpop.f32.mrf.mxu2 }
 0x24b   : >> { %v774_v34 = vadd.f32 %v1226_v12, %v773_v33 }
 0x24d   : >> { %v780_v35 = vadd.f32 %v1388_v21, %v774_v34  ;;  %v788_v36 = vadd.f32 %v1372_v24, %v774_v34  }
 0x24f   : >> { %v784_v21 = vmul.f32 %v1543_v15, %v780_v35   ;;  %v1806_v24 = vmov %v788_v36  ;;  %v792_v10 = vmul.f32 (%p421_p11), %v1543_v15, %v788_v36 }
 0x252   : >> { %v775_v37 = vpop.f32.mrf.mxu2 }
 0x253   : >> { %v776_v26 = vadd.f32 %v1226_v12, %v775_v37  ;;  %423 = sbr.rel (!%p421_p11) target bundleno = 34 (0x22), region = 111 }
 0x255   : >> { %v781_v39 = vadd.f32 %v1384_v22, %v776_v26  ;;  %v789_v40 = vadd.f32 %v1368_v23, %v776_v26   ;;  %v1808_v26 = vmov %v786_v56 }
 0x257   : >> { %v785_v22 = vmul.f32 %v1545_v16, %v781_v39   ;;  %v1805_v23 = vmov %v789_v40  ;;  %v793_v11 = vmul.f32 (%p421_p11), %v1545_v16, %v789_v40 }
 0x259   : > { %v799_v13 = vpack.c.bf16 %v793_v11, %v792_v10 }
 0x25b   : > { %808 = vrot.lane.b32.xlu0 %v799_v13, %s1407_s13  ;;  %s1278_s13 = sshra.s32 %s869_s25, 4  ;;  %s1279_s13 = int_to_ptr.hbm [resolvable:$true] %s1278_s13 }
 0x25c   : > { %s1280_s16 = scalar_lea.hbm %s1279_s13, 32  ;;  %p1285_p1 = scmp.lt.s32.totalorder %s1279_s13, %s1801_s11 }
 0x25d   : > { %p1281_p12 = scmp.ne.s32.totalorder %s1279_s13, %s1280_s16  ;;  %p1286_p2 = scmp.lt.s32.totalorder %s1284_s18, %s1280_s16 }
 0x25f   : > { %p1282_p13 = pnand %p1281_p12, %p1511_p5  ;;  %p1287_p3 = por %p1286_p2, %p1285_p1 }
 0x261   : > { %p1283_p0 = pneg %p1282_p13 }
 0x263   : > { %p1288_p4 = pnand %p1287_p3, %p1283_p0 }
 0x2af   : > { %v807_v14 = vpop.permute.xlu0 %806 }
 0x2b0   : > { %1053 = vmatmul.msk.bf16.vlgmr.msra.gmra.mxu0 %vm485_vm7, %v807_v14 }
 0x2cd   : > { %v809_v17 = vpop.permute.xlu0 %808 }
 0x2ce   : > { %1054 = vmatmul.msk.bf16.vlgmr.msra.gmra.mxu1 %vm485_vm7, %v809_v17 }
 0x32d   : > { %v838_v15 = vpop.f32.mrf.mxu0 }
 0x32e   : > { %v839_v19 = vadd.f32 %v1251_v18, %v838_v15 }
 0x330   : > { %849 = vst.msk [vmem:[%s1556_s15] sm:$0xff] %vm490_vm8, %v839_v19 }
 0x335   : > { %v840_v16 = vpop.f32.mrf.mxu0 }
 0x336   : > { %v841_v21 = vadd.f32 %v1251_v18, %v840_v16 }
 0x338   : > { %850 = vst.msk [vmem:[%s1556_s15 + $0x8] sm:$0xff] %vm490_vm8, %v841_v21 }
 0x34b   : > { %v843_v20 = vpop.f32.mrf.mxu1 }
 0x34c   : > { %v844_v22 = vadd.f32 %v1251_v18, %v843_v20 }
 0x34e   : > { %851 = vst.msk [vmem:[%s1556_s15 + $0x10] sm:$0xff] %vm490_vm8, %v844_v22 }
 0x353   : > { %v845_v23 = vpop.f32.mrf.mxu1 }
 0x354   : > { %v846_v24 = vadd.f32 %v1251_v18, %v845_v23 }
 0x356   : > { %852 = vst.msk [vmem:[%s1556_s15 + $0x18] sm:$0xff] %vm490_vm8, %v846_v24 }
 0x357   : > { %1291 = shalt.err (!%p1288_p4)
}
 0x358   : > { %s1408_s15 = smov 128   ;;  %s1409_s0 = smov 8  }
 0x359   : > { %1085 = dma.vmem_to_hbm [thread:$0]  (%p1511_p5), %s867_s20, 512, %s869_s25, %s854_s27, %s1408_s15, %s1408_s15, %s1409_s0  }
 0x35a PF: > { %p1091_p7 = scmp.ge.s32.totalorder %s1364_s24, 2  ;;  %s883_s28 = sand.u32 1, %s1352_s21  }
 0x35b   : > { %s884_s17 = scalar_lea.sflag [#allocation5], %s883_s28 }
 0x35c   : > { %p1088_p8 = pnand %p1091_p7, %p1515_p6 }
 0x35e   : > { %p1089_p9 = pneg %p1088_p8 }
 0x360   : > { %1347 = dma.done.wait (%p1089_p9), %s884_s17, 512  }
 0x361   : > { %1349 = vsyncadd (%p1089_p9), %s884_s17, 4294966784  ;;  %p29_p10 = scmp.ge.s32.totalorder %s1498_s26, 4   ;;  %s1810_s21 = smov %s1356_s22 }
 0x362   : > { %s1811_s22 = smov %s1360_s23  ;;  %s1812_s23 = smov %s1509_s29 }
 0x363   : > { %s1813_s24 = smov %s1498_s26  ;;  %31 = sbr.rel (!%p29_p10) target bundleno = 9 (0x9), region = 122 }
 0x368   :  { %890 = vsyncpa [#allocation5], 1 }
 0x369   :  { %892 = vsyncpa [#allocation5 + $0x1], 1 }

</bundles_post_ra>
